<compile_context>
chip_gen: v6e
topology: v6e:2x2x1
jax: 0.10.0
libtpu: 0.0.40
codegen_flags: <defaults>
</compile_context>

<pallas_src>
import functools
import math

import jax
import jax.numpy as jnp
from jax.experimental import pallas as pl
from jax.experimental.pallas import tpu as pltpu

PMAX = 3          # widest halo (kernel 7 -> shift 3)
MID = 64          # hidden channels of every branch (fixed by the module)
KSIZES = (3, 5, 7)


def _spectral_kernel(x_ref, w1_ref, w2_ref, wf_ref,
                     vec1_ref, b2_ref, vecf_ref, o_ref, *, cs):
  """One grid step: TB slabs, each slab's spectral axis of width `cs` on lanes."""
  H, L = x_ref.shape            # L = TB * cs
  cout = o_ref.shape[0]
  f32 = jnp.float32

  x = x_ref[...]                                                  # (H, L) f32

  # Hoisted boundary masks: one (1, L) 0/1 row per halo shift, reused for both
  # the input-side (x) and output-side (per-tap) shifts.
  pos = jax.lax.broadcasted_iota(jnp.int32, (1, L), 1) % cs
  keep = {}
  for d in range(1, PMAX + 1):
    keep[d] = (pos < (cs - d)).astype(f32)       # positive shift: drop tail
    keep[-d] = (pos >= d).astype(f32)            # negative shift: drop head

  def shift(arr, d):
    # y[.., t*cs + c] = arr[.., t*cs + c + d], zero outside the slab.
    if d == 0:
      return arr
    return pltpu.roll(arr, shift=(-d) % L, axis=1) * keep[d]      # XLU + vmul

  # Shared im2col stack for the widest halo (k=7): (7*H, L).
  rhs = jnp.concatenate([shift(x, d) for d in range(-PMAX, PMAX + 1)],
                        axis=0).astype(jnp.bfloat16)

  # Merged conv1 of all three branches: (3*MID, 7*H) x (7*H, L).
  z1 = jnp.dot(w1_ref[...], rhs, preferred_element_type=f32)      # (3*MID, L)
  vec1 = vec1_ref[...]                                            # (3*MID, 3)
  b1 = vec1[:, 0:1]
  s1 = vec1[:, 1:2]
  t1 = vec1[:, 2:3]
  h = jnp.maximum(z1 + b1, 0.0) * s1 + t1                         # ReLU -> BN1

  # Merged block-diagonal conv2, taps stacked on M: (15*Cout, 3*MID) x (3*MID, L).
  p_all = jnp.dot(w2_ref[...], h.astype(jnp.bfloat16),
                  preferred_element_type=f32)                     # (15*Cout, L)

  # Output-side im2col: roll/mask the small (Cout, L) per-tap outputs and
  # accumulate per branch; ReLU only (BN2 is folded into the fusion weights).
  b2 = b2_ref[...]                                                # (3*Cout, 1)
  parts = []
  row = 0
  for bi, k in enumerate(KSIZES):
    p = (k - 1) // 2
    acc = shift(p_all[row:row + cout], -p)
    for dk in range(1, k):
      acc = acc + shift(p_all[row + dk * cout:row + (dk + 1) * cout], dk - p)
    row += k * cout
    parts.append(jnp.maximum(acc + b2[bi * cout:(bi + 1) * cout], 0.0)
                 .astype(jnp.bfloat16))

  cat = jnp.concatenate(parts, axis=0)                            # (3*Cout, L)
  zf = jnp.dot(wf_ref[...], cat, preferred_element_type=f32)      # (Cout, L)
  vf = vecf_ref[...]                                              # (Cout, 3)
  bf = vf[:, 0:1]
  sf = vf[:, 1:2]
  tf = vf[:, 2:3]
  o_ref[...] = jnp.maximum(zf + bf, 0.0) * sf + tf                # lane-dense


def _pick_slabs_per_step(n_slabs, cs, step, lane_cap=4096):
  """Largest slab count per step that (a) keeps L = tb*cs a multiple of 128,
  (b) stays under `lane_cap` lanes, (c) prefers >= 2 grid steps (pipelining,
  v7x dual TensorCores)."""
  cands = [tb for tb in range(step, n_slabs + 1, step) if n_slabs % tb == 0]
  if not cands:
    return n_slabs
  fits = [tb for tb in cands if tb * cs <= lane_cap] or [min(cands)]
  multi = [tb for tb in fits if (n_slabs // tb) >= 2]
  return max(multi) if multi else max(fits)


def spectral_feature_extractor(x, params):
  """x: (B, C_spec, H, W) float32 -> (B, C_spec, C_out, W) float32."""
  B, Cs, H, W = x.shape
  Cout = params["vecf"].shape[0]
  ns = B * W

  # Pad the slab count so a 128-aligned lane tile always exists.
  step = 128 // math.gcd(Cs, 128)
  ns_pad = ((ns + step - 1) // step) * step
  tb = _pick_slabs_per_step(ns_pad, Cs, step)
  L = tb * Cs
  n_steps = ns_pad // tb

  # x_in[h, (b*W + w)*Cs + c] = x[b, c, h, w]: per-slab spectral axis on lanes.
  x_in = jnp.transpose(x, (2, 0, 3, 1)).reshape(H, ns * Cs)
  if ns_pad != ns:
    x_in = jnp.pad(x_in, ((0, 0), (0, (ns_pad - ns) * Cs)))

  order = ["w1", "w2", "wf", "vec1", "b2", "vecf"]
  param_args = [params[n] for n in order]

  def full(a):
    return pl.BlockSpec(a.shape, lambda g: (0,) * a.ndim)

  # ~8 KB of live intermediates per lane is a generous bound (double-buffered
  # I/O blocks + im2col + h + p_all); keep the limit v7x-safe (< 64 MiB).
  vmem_limit = int(min(48 * 1024 * 1024, max(16 * 1024 * 1024, 8 * 1024 * L)))

  y = pl.pallas_call(
      functools.partial(_spectral_kernel, cs=Cs),
      out_shape=jax.ShapeDtypeStruct((Cout, ns_pad * Cs), jnp.float32),
      grid_spec=pltpu.PrefetchScalarGridSpec(
          num_scalar_prefetch=0,
          grid=(n_steps,),
          in_specs=[pl.BlockSpec((H, L), lambda g: (0, g))]
                   + [full(a) for a in param_args],
          out_specs=pl.BlockSpec((Cout, L), lambda g: (0, g))),
      compiler_params=pltpu.CompilerParams(
          dimension_semantics=("parallel",),
          vmem_limit_bytes=vmem_limit),
  )(x_in, *param_args)

  y = y[:, :ns * Cs]
  # (Cout, B*W*Cs) -> (B, Cs, Cout, W) == permute(0,3,1,2) of the torch output.
  return jnp.transpose(y.reshape(Cout, B, W, Cs), (1, 3, 0, 2))


# ----------------------------- parameters -----------------------------------

def _layer_params(key, cin, cout, k):
  kw, kb, kg, kbt, km, kv = jax.random.split(key, 6)
  fan = float(cin * k)
  w = jax.random.uniform(kw, (cout, cin, 1, k), jnp.float32, -1.0, 1.0) \
      / jnp.sqrt(fan)
  b = jax.random.uniform(kb, (cout,), jnp.float32, -1.0, 1.0) / jnp.sqrt(fan)
  gamma = 1.0 + 0.1 * jax.random.normal(kg, (cout,), jnp.float32)
  beta = 0.1 * jax.random.normal(kbt, (cout,), jnp.float32)
  mean = 0.1 * jax.random.normal(km, (cout,), jnp.float32)
  var = jnp.abs(jax.random.normal(kv, (cout,), jnp.float32)) + 0.5
  return dict(w=w, b=b, gamma=gamma, beta=beta, mean=mean, var=var)


def _bn_fold(lp, eps=1e-5):
  s = lp["gamma"] / jnp.sqrt(lp["var"] + eps)
  t = lp["beta"] - lp["mean"] * s
  return s, t


def pack_params(raw):
  """Fold conv bias + eval-mode BN and pack into merged, MXU-friendly tensors."""
  H = raw["13"]["w"].shape[1]
  Cout = raw["f"]["w"].shape[0]
  KW = 2 * PMAX + 1

  # Merged conv1 weight (3*MID, 7*H): branch bi in rows bi*MID..; tap dk of a
  # k-branch lands at columns (dk - p + PMAX)*H .. +H (missing taps stay zero).
  w1_all = jnp.zeros((3 * MID, KW * H), jnp.float32)
  b1s, s1s, t1s = [], [], []
  for bi, k in enumerate(KSIZES):
    p = (k - 1) // 2
    lp1 = raw["1%d" % k]
    w1 = lp1["w"][:, :, 0, :]                                    # (MID, H, k)
    for dk in range(k):
      col = (dk - p + PMAX) * H
      w1_all = w1_all.at[bi * MID:(bi + 1) * MID, col:col + H].set(w1[:, :, dk])
    s1, t1 = _bn_fold(lp1)
    b1s.append(lp1["b"]); s1s.append(s1); t1s.append(t1)
  vec1 = jnp.stack([jnp.concatenate(b1s), jnp.concatenate(s1s),
                    jnp.concatenate(t1s)], axis=1)               # (3*MID, 3)

  # Merged block-diagonal conv2 weight ((3+5+7)*Cout, 3*MID):
  # row (row_off + dk*Cout + m), columns bi*MID..(bi+1)*MID hold w2[m, :, dk].
  rows = sum(KSIZES) * Cout
  w2_all = jnp.zeros((rows, 3 * MID), jnp.float32)
  b2s = []
  row = 0
  for bi, k in enumerate(KSIZES):
    lp2 = raw["2%d" % k]
    w2 = lp2["w"][:, :, 0, :]                                    # (Cout, MID, k)
    w2_taps = jnp.transpose(w2, (2, 0, 1)).reshape(k * Cout, MID)
    w2_all = w2_all.at[row:row + k * Cout, bi * MID:(bi + 1) * MID].set(w2_taps)
    row += k * Cout
    b2s.append(lp2["b"])
  b2 = jnp.concatenate(b2s)[:, None]                             # (3*Cout, 1)

  # Fusion 1x1 conv with each branch's 2nd BN folded in:
  #   wf_b' = wf_b * s2_b (column scale),  bf' = bf + sum_b wf_b @ t2_b.
  lpf = raw["f"]
  wf = lpf["w"][:, :, 0, 0]                                      # (Cout, 3*Cout)
  sf, tf = _bn_fold(lpf)
  bias_f = lpf["b"]
  wf_parts = []
  for bi, k in enumerate(KSIZES):
    s2, t2 = _bn_fold(raw["2%d" % k])
    wf_b = wf[:, bi * Cout:(bi + 1) * Cout]
    wf_parts.append(wf_b * s2[None, :])
    bias_f = bias_f + wf_b @ t2
  wf_folded = jnp.concatenate(wf_parts, axis=1)                  # (Cout, 3*Cout)
  vecf = jnp.stack([bias_f, sf, tf], axis=1)                     # (Cout, 3)

  return dict(w1=w1_all.astype(jnp.bfloat16),
              w2=w2_all.astype(jnp.bfloat16),
              wf=wf_folded.astype(jnp.bfloat16),
              vec1=vec1, b2=b2, vecf=vecf)


# ------------------------- pure-JAX reference --------------------------------

def _ref_forward(x, raw):
  hi = jax.lax.Precision.HIGHEST

  def conv(x, lp, pad):
    y = jax.lax.conv_general_dilated(
        x, lp["w"], (1, 1), ((0, 0), (pad, pad)),
        dimension_numbers=("NCHW", "OIHW", "NCHW"), precision=hi)
    return y + lp["b"][None, :, None, None]

  def bn(x, lp):
    eps = 1e-5
    s = lp["gamma"] / jnp.sqrt(lp["var"] + eps)
    t = lp["beta"] - lp["mean"] * s
    return x * s[None, :, None, None] + t[None, :, None, None]

  def block(x, lp1, lp2, pad):
    h = bn(jax.nn.relu(conv(x, lp1, pad)), lp1)
    return bn(jax.nn.relu(conv(h, lp2, pad)), lp2)

  xp = jnp.transpose(x, (0, 2, 3, 1))     # Conv2d sees this as NCHW
  b3 = block(xp, raw["13"], raw["23"], 1)
  b5 = block(xp, raw["15"], raw["25"], 2)
  b7 = block(xp, raw["17"], raw["27"], 3)
  cat = jnp.concatenate([b3, b5, b7], axis=1)
  f = bn(jax.nn.relu(conv(cat, raw["f"], 0)), raw["f"])
  return jnp.transpose(f, (0, 3, 1, 2))


# --------------------------------- main ---------------------------------------

if __name__ == "__main__":
  key = jax.random.PRNGKey(0)
  # NCHW input; the module's `in_channels` corresponds to H after its permute.
  B, Cs, H, W = 2, 32, 8, 8
  Cout = 16

  kx, kp = jax.random.split(key)
  x = jax.random.normal(kx, (B, Cs, H, W), jnp.float32)

  lk = jax.random.split(kp, 7)
  raw = {
      "13": _layer_params(lk[0], H, MID, 3),
      "23": _layer_params(lk[1], MID, Cout, 3),
      "15": _layer_params(lk[2], H, MID, 5),
      "25": _layer_params(lk[3], MID, Cout, 5),
      "17": _layer_params(lk[4], H, MID, 7),
      "27": _layer_params(lk[5], MID, Cout, 7),
      "f":  _layer_params(lk[6], 3 * Cout, Cout, 1),
  }
  params = pack_params(raw)

  out = jax.jit(spectral_feature_extractor)(x, params)
  out = jax.block_until_ready(out)

  ref = _ref_forward(x, raw)
  assert out.shape == (B, Cs, Cout, W), out.shape
  err = float(jnp.max(jnp.abs(out - ref)))
  assert err < 5e-2, f"max abs error too large: {err}"
  print("KERNEL_OK")
</pallas_src>

<mosaic_0001>
module attributes {stable_mosaic.version = 11 : i64} {
  func.func @_spectral_kernel(%arg0: i32, %arg1: memref<8x256xf32, #tpu.memory_space<vmem>>, %arg2: memref<192x56xbf16, #tpu.memory_space<vmem>>, %arg3: memref<240x192xbf16, #tpu.memory_space<vmem>>, %arg4: memref<16x48xbf16, #tpu.memory_space<vmem>>, %arg5: memref<192x3xf32, #tpu.memory_space<vmem>>, %arg6: memref<48x1xf32, #tpu.memory_space<vmem>>, %arg7: memref<16x3xf32, #tpu.memory_space<vmem>>, %arg8: memref<16x256xf32, #tpu.memory_space<vmem>>) attributes {dimension_semantics = [#tpu.dimension_semantics<parallel>], iteration_bounds = array<i64: 2>, scalar_prefetch = 0 : i64, scratch_operands = 0 : i64, tpu.core_type = #tpu.core_type<tc>, window_params = [{transform_indices = @transform_0, window_bounds = array<i64: 8, 256>}, {pipeline_mode = #tpu.pipeline_mode<synchronous>, transform_indices = @transform_1, window_bounds = array<i64: 192, 56>}, {pipeline_mode = #tpu.pipeline_mode<synchronous>, transform_indices = @transform_2, window_bounds = array<i64: 240, 192>}, {pipeline_mode = #tpu.pipeline_mode<synchronous>, transform_indices = @transform_3, window_bounds = array<i64: 16, 48>}, {pipeline_mode = #tpu.pipeline_mode<synchronous>, transform_indices = @transform_4, window_bounds = array<i64: 192, 3>}, {pipeline_mode = #tpu.pipeline_mode<synchronous>, transform_indices = @transform_5, window_bounds = array<i64: 48, 1>}, {pipeline_mode = #tpu.pipeline_mode<synchronous>, transform_indices = @transform_6, window_bounds = array<i64: 16, 3>}, {transform_indices = @transform_7, window_bounds = array<i64: 16, 256>}]} {
    %c0 = arith.constant 0 : index
    %c0_0 = arith.constant 0 : index
    %0 = vector.load %arg1[%c0, %c0_0] : memref<8x256xf32, #tpu.memory_space<vmem>>, vector<8x256xf32>
    %1 = tpu.iota {dimensions = array<i32: 1>} : vector<1x256xi32>
    %c32_i32 = arith.constant 32 : i32
    %c0_i32 = arith.constant 0 : i32
    %2 = arith.cmpi eq, %c32_i32, %c0_i32 : i32
    %c1_i32 = arith.constant 1 : i32
    %3 = arith.select %2, %c1_i32, %c32_i32 : i32
    %4 = vector.broadcast %3 : i32 to vector<1x256xi32>
    %5 = arith.remsi %1, %4 : vector<1x256xi32>
    %c0_i32_1 = arith.constant 0 : i32
    %6 = vector.broadcast %c0_i32_1 : i32 to vector<1x256xi32>
    %7 = arith.cmpi ne, %5, %6 : vector<1x256xi32>
    %c0_i32_2 = arith.constant 0 : i32
    %8 = vector.broadcast %c0_i32_2 : i32 to vector<1x256xi32>
    %9 = arith.cmpi slt, %5, %8 : vector<1x256xi32>
    %c0_i32_3 = arith.constant 0 : i32
    %10 = arith.cmpi slt, %3, %c0_i32_3 : i32
    %11 = vector.broadcast %10 : i1 to vector<1x256xi1>
    %12 = vector.broadcast %11 : vector<1x256xi1> to vector<1x256xi1>
    %13 = arith.xori %9, %12 : vector<1x256xi1>
    %14 = arith.andi %13, %7 : vector<1x256xi1>
    %15 = vector.broadcast %3 : i32 to vector<1x256xi32>
    %16 = arith.addi %5, %15 : vector<1x256xi32>
    %17 = arith.select %14, %16, %5 : vector<1x256xi1>, vector<1x256xi32>
    %c31_i32 = arith.constant 31 : i32
    %18 = vector.broadcast %c31_i32 : i32 to vector<1x256xi32>
    %19 = arith.cmpi slt, %17, %18 : vector<1x256xi32>
    %20 = arith.extui %19 : vector<1x256xi1> to vector<1x256xi32>
    %21 = arith.sitofp %20 : vector<1x256xi32> to vector<1x256xf32>
    %c1_i32_4 = arith.constant 1 : i32
    %22 = vector.broadcast %c1_i32_4 : i32 to vector<1x256xi32>
    %23 = arith.cmpi sge, %17, %22 : vector<1x256xi32>
    %24 = arith.extui %23 : vector<1x256xi1> to vector<1x256xi32>
    %25 = arith.sitofp %24 : vector<1x256xi32> to vector<1x256xf32>
    %c30_i32 = arith.constant 30 : i32
    %26 = vector.broadcast %c30_i32 : i32 to vector<1x256xi32>
    %27 = arith.cmpi slt, %17, %26 : vector<1x256xi32>
    %28 = arith.extui %27 : vector<1x256xi1> to vector<1x256xi32>
    %29 = arith.sitofp %28 : vector<1x256xi32> to vector<1x256xf32>
    %c2_i32 = arith.constant 2 : i32
    %30 = vector.broadcast %c2_i32 : i32 to vector<1x256xi32>
    %31 = arith.cmpi sge, %17, %30 : vector<1x256xi32>
    %32 = arith.extui %31 : vector<1x256xi1> to vector<1x256xi32>
    %33 = arith.sitofp %32 : vector<1x256xi32> to vector<1x256xf32>
    %c29_i32 = arith.constant 29 : i32
    %34 = vector.broadcast %c29_i32 : i32 to vector<1x256xi32>
    %35 = arith.cmpi slt, %17, %34 : vector<1x256xi32>
    %36 = arith.extui %35 : vector<1x256xi1> to vector<1x256xi32>
    %37 = arith.sitofp %36 : vector<1x256xi32> to vector<1x256xf32>
    %c3_i32 = arith.constant 3 : i32
    %38 = vector.broadcast %c3_i32 : i32 to vector<1x256xi32>
    %39 = arith.cmpi sge, %17, %38 : vector<1x256xi32>
    %40 = arith.extui %39 : vector<1x256xi1> to vector<1x256xi32>
    %41 = arith.sitofp %40 : vector<1x256xi32> to vector<1x256xf32>
    %c3_i32_5 = arith.constant 3 : i32
    %42 = tpu.dynamic_rotate %0 by %c3_i32_5 dim 1 : vector<8x256xf32>, i32 -> vector<8x256xf32>
    %43 = vector.broadcast %41 : vector<1x256xf32> to vector<8x256xf32>
    %44 = arith.mulf %42, %43 : vector<8x256xf32>
    %c2_i32_6 = arith.constant 2 : i32
    %45 = tpu.dynamic_rotate %0 by %c2_i32_6 dim 1 : vector<8x256xf32>, i32 -> vector<8x256xf32>
    %46 = vector.broadcast %33 : vector<1x256xf32> to vector<8x256xf32>
    %47 = arith.mulf %45, %46 : vector<8x256xf32>
    %c1_i32_7 = arith.constant 1 : i32
    %48 = tpu.dynamic_rotate %0 by %c1_i32_7 dim 1 : vector<8x256xf32>, i32 -> vector<8x256xf32>
    %49 = vector.broadcast %25 : vector<1x256xf32> to vector<8x256xf32>
    %50 = arith.mulf %48, %49 : vector<8x256xf32>
    %c255_i32 = arith.constant 255 : i32
    %51 = tpu.dynamic_rotate %0 by %c255_i32 dim 1 : vector<8x256xf32>, i32 -> vector<8x256xf32>
    %52 = vector.broadcast %21 : vector<1x256xf32> to vector<8x256xf32>
    %53 = arith.mulf %51, %52 : vector<8x256xf32>
    %c254_i32 = arith.constant 254 : i32
    %54 = tpu.dynamic_rotate %0 by %c254_i32 dim 1 : vector<8x256xf32>, i32 -> vector<8x256xf32>
    %55 = vector.broadcast %29 : vector<1x256xf32> to vector<8x256xf32>
    %56 = arith.mulf %54, %55 : vector<8x256xf32>
    %c253_i32 = arith.constant 253 : i32
    %57 = tpu.dynamic_rotate %0 by %c253_i32 dim 1 : vector<8x256xf32>, i32 -> vector<8x256xf32>
    %58 = vector.broadcast %37 : vector<1x256xf32> to vector<8x256xf32>
    %59 = arith.mulf %57, %58 : vector<8x256xf32>
    %60 = tpu.concatenate %44, %47, %50, %0, %53, %56, %59 in 0 : vector<8x256xf32>, vector<8x256xf32>, vector<8x256xf32>, vector<8x256xf32>, vector<8x256xf32>, vector<8x256xf32>, vector<8x256xf32> -> vector<56x256xf32>
    %61 = arith.truncf %60 : vector<56x256xf32> to vector<56x256xbf16>
    %c0_8 = arith.constant 0 : index
    %c0_9 = arith.constant 0 : index
    %62 = vector.load %arg2[%c0_8, %c0_9] : memref<192x56xbf16, #tpu.memory_space<vmem>>, vector<192x56xbf16>
    %cst = arith.constant dense<0.000000e+00> : vector<192x256xf32>
    %63 = tpu.matmul %62, %61, %cst {dimension_numbers = #tpu.dot_dimension_numbers<[1], [0], [0], [1], [0, 0, 1, 1], [], []>} : vector<192x56xbf16>, vector<56x256xbf16>, vector<192x256xf32> -> vector<192x256xf32>
    %c0_10 = arith.constant 0 : index
    %c0_11 = arith.constant 0 : index
    %64 = vector.load %arg5[%c0_10, %c0_11] : memref<192x3xf32, #tpu.memory_space<vmem>>, vector<192x3xf32>
    %65 = vector.extract_strided_slice %64 {offsets = [0, 0], sizes = [192, 1], strides = [1, 1]} : vector<192x3xf32> to vector<192x1xf32>
    %66 = vector.extract_strided_slice %64 {offsets = [0, 1], sizes = [192, 1], strides = [1, 1]} : vector<192x3xf32> to vector<192x1xf32>
    %67 = vector.extract_strided_slice %64 {offsets = [0, 2], sizes = [192, 1], strides = [1, 1]} : vector<192x3xf32> to vector<192x1xf32>
    %68 = vector.broadcast %65 : vector<192x1xf32> to vector<192x256xf32>
    %69 = arith.addf %63, %68 : vector<192x256xf32>
    %cst_12 = arith.constant 0.000000e+00 : f32
    %70 = vector.broadcast %cst_12 : f32 to vector<192x256xf32>
    %71 = arith.maximumf %69, %70 : vector<192x256xf32>
    %72 = vector.broadcast %66 : vector<192x1xf32> to vector<192x256xf32>
    %73 = arith.mulf %71, %72 : vector<192x256xf32>
    %74 = vector.broadcast %67 : vector<192x1xf32> to vector<192x256xf32>
    %75 = arith.addf %73, %74 : vector<192x256xf32>
    %c0_13 = arith.constant 0 : index
    %c0_14 = arith.constant 0 : index
    %76 = vector.load %arg3[%c0_13, %c0_14] : memref<240x192xbf16, #tpu.memory_space<vmem>>, vector<240x192xbf16>
    %77 = arith.truncf %75 : vector<192x256xf32> to vector<192x256xbf16>
    %cst_15 = arith.constant dense<0.000000e+00> : vector<240x256xf32>
    %78 = tpu.matmul %76, %77, %cst_15 {dimension_numbers = #tpu.dot_dimension_numbers<[1], [0], [0], [1], [0, 0, 1, 1], [], []>} : vector<240x192xbf16>, vector<192x256xbf16>, vector<240x256xf32> -> vector<240x256xf32>
    %c0_16 = arith.constant 0 : index
    %c0_17 = arith.constant 0 : index
    %79 = vector.load %arg6[%c0_16, %c0_17] : memref<48x1xf32, #tpu.memory_space<vmem>>, vector<48x1xf32>
    %80 = vector.extract_strided_slice %78 {offsets = [0, 0], sizes = [16, 256], strides = [1, 1]} : vector<240x256xf32> to vector<16x256xf32>
    %c1_i32_18 = arith.constant 1 : i32
    %81 = tpu.dynamic_rotate %80 by %c1_i32_18 dim 1 : vector<16x256xf32>, i32 -> vector<16x256xf32>
    %82 = vector.broadcast %25 : vector<1x256xf32> to vector<16x256xf32>
    %83 = arith.mulf %81, %82 : vector<16x256xf32>
    %84 = vector.extract_strided_slice %78 {offsets = [16, 0], sizes = [16, 256], strides = [1, 1]} : vector<240x256xf32> to vector<16x256xf32>
    %85 = arith.addf %83, %84 : vector<16x256xf32>
    %86 = vector.extract_strided_slice %78 {offsets = [32, 0], sizes = [16, 256], strides = [1, 1]} : vector<240x256xf32> to vector<16x256xf32>
    %c255_i32_19 = arith.constant 255 : i32
    %87 = tpu.dynamic_rotate %86 by %c255_i32_19 dim 1 : vector<16x256xf32>, i32 -> vector<16x256xf32>
    %88 = vector.broadcast %21 : vector<1x256xf32> to vector<16x256xf32>
    %89 = arith.mulf %87, %88 : vector<16x256xf32>
    %90 = arith.addf %85, %89 : vector<16x256xf32>
    %91 = vector.extract_strided_slice %79 {offsets = [0, 0], sizes = [16, 1], strides = [1, 1]} : vector<48x1xf32> to vector<16x1xf32>
    %92 = vector.broadcast %91 : vector<16x1xf32> to vector<16x256xf32>
    %93 = arith.addf %90, %92 : vector<16x256xf32>
    %cst_20 = arith.constant 0.000000e+00 : f32
    %94 = vector.broadcast %cst_20 : f32 to vector<16x256xf32>
    %95 = arith.maximumf %93, %94 : vector<16x256xf32>
    %96 = arith.truncf %95 : vector<16x256xf32> to vector<16x256xbf16>
    %97 = vector.extract_strided_slice %78 {offsets = [48, 0], sizes = [16, 256], strides = [1, 1]} : vector<240x256xf32> to vector<16x256xf32>
    %c2_i32_21 = arith.constant 2 : i32
    %98 = tpu.dynamic_rotate %97 by %c2_i32_21 dim 1 : vector<16x256xf32>, i32 -> vector<16x256xf32>
    %99 = vector.broadcast %33 : vector<1x256xf32> to vector<16x256xf32>
    %100 = arith.mulf %98, %99 : vector<16x256xf32>
    %101 = vector.extract_strided_slice %78 {offsets = [64, 0], sizes = [16, 256], strides = [1, 1]} : vector<240x256xf32> to vector<16x256xf32>
    %c1_i32_22 = arith.constant 1 : i32
    %102 = tpu.dynamic_rotate %101 by %c1_i32_22 dim 1 : vector<16x256xf32>, i32 -> vector<16x256xf32>
    %103 = vector.broadcast %25 : vector<1x256xf32> to vector<16x256xf32>
    %104 = arith.mulf %102, %103 : vector<16x256xf32>
    %105 = arith.addf %100, %104 : vector<16x256xf32>
    %106 = vector.extract_strided_slice %78 {offsets = [80, 0], sizes = [16, 256], strides = [1, 1]} : vector<240x256xf32> to vector<16x256xf32>
    %107 = arith.addf %105, %106 : vector<16x256xf32>
    %108 = vector.extract_strided_slice %78 {offsets = [96, 0], sizes = [16, 256], strides = [1, 1]} : vector<240x256xf32> to vector<16x256xf32>
    %c255_i32_23 = arith.constant 255 : i32
    %109 = tpu.dynamic_rotate %108 by %c255_i32_23 dim 1 : vector<16x256xf32>, i32 -> vector<16x256xf32>
    %110 = vector.broadcast %21 : vector<1x256xf32> to vector<16x256xf32>
    %111 = arith.mulf %109, %110 : vector<16x256xf32>
    %112 = arith.addf %107, %111 : vector<16x256xf32>
    %113 = vector.extract_strided_slice %78 {offsets = [112, 0], sizes = [16, 256], strides = [1, 1]} : vector<240x256xf32> to vector<16x256xf32>
    %c254_i32_24 = arith.constant 254 : i32
    %114 = tpu.dynamic_rotate %113 by %c254_i32_24 dim 1 : vector<16x256xf32>, i32 -> vector<16x256xf32>
    %115 = vector.broadcast %29 : vector<1x256xf32> to vector<16x256xf32>
    %116 = arith.mulf %114, %115 : vector<16x256xf32>
    %117 = arith.addf %112, %116 : vector<16x256xf32>
    %118 = vector.extract_strided_slice %79 {offsets = [16, 0], sizes = [16, 1], strides = [1, 1]} : vector<48x1xf32> to vector<16x1xf32>
    %119 = vector.broadcast %118 : vector<16x1xf32> to vector<16x256xf32>
    %120 = arith.addf %117, %119 : vector<16x256xf32>
    %cst_25 = arith.constant 0.000000e+00 : f32
    %121 = vector.broadcast %cst_25 : f32 to vector<16x256xf32>
    %122 = arith.maximumf %120, %121 : vector<16x256xf32>
    %123 = arith.truncf %122 : vector<16x256xf32> to vector<16x256xbf16>
    %124 = vector.extract_strided_slice %78 {offsets = [128, 0], sizes = [16, 256], strides = [1, 1]} : vector<240x256xf32> to vector<16x256xf32>
    %c3_i32_26 = arith.constant 3 : i32
    %125 = tpu.dynamic_rotate %124 by %c3_i32_26 dim 1 : vector<16x256xf32>, i32 -> vector<16x256xf32>
    %126 = vector.broadcast %41 : vector<1x256xf32> to vector<16x256xf32>
    %127 = arith.mulf %125, %126 : vector<16x256xf32>
    %128 = vector.extract_strided_slice %78 {offsets = [144, 0], sizes = [16, 256], strides = [1, 1]} : vector<240x256xf32> to vector<16x256xf32>
    %c2_i32_27 = arith.constant 2 : i32
    %129 = tpu.dynamic_rotate %128 by %c2_i32_27 dim 1 : vector<16x256xf32>, i32 -> vector<16x256xf32>
    %130 = vector.broadcast %33 : vector<1x256xf32> to vector<16x256xf32>
    %131 = arith.mulf %129, %130 : vector<16x256xf32>
    %132 = arith.addf %127, %131 : vector<16x256xf32>
    %133 = vector.extract_strided_slice %78 {offsets = [160, 0], sizes = [16, 256], strides = [1, 1]} : vector<240x256xf32> to vector<16x256xf32>
    %c1_i32_28 = arith.constant 1 : i32
    %134 = tpu.dynamic_rotate %133 by %c1_i32_28 dim 1 : vector<16x256xf32>, i32 -> vector<16x256xf32>
    %135 = vector.broadcast %25 : vector<1x256xf32> to vector<16x256xf32>
    %136 = arith.mulf %134, %135 : vector<16x256xf32>
    %137 = arith.addf %132, %136 : vector<16x256xf32>
    %138 = vector.extract_strided_slice %78 {offsets = [176, 0], sizes = [16, 256], strides = [1, 1]} : vector<240x256xf32> to vector<16x256xf32>
    %139 = arith.addf %137, %138 : vector<16x256xf32>
    %140 = vector.extract_strided_slice %78 {offsets = [192, 0], sizes = [16, 256], strides = [1, 1]} : vector<240x256xf32> to vector<16x256xf32>
    %c255_i32_29 = arith.constant 255 : i32
    %141 = tpu.dynamic_rotate %140 by %c255_i32_29 dim 1 : vector<16x256xf32>, i32 -> vector<16x256xf32>
    %142 = vector.broadcast %21 : vector<1x256xf32> to vector<16x256xf32>
    %143 = arith.mulf %141, %142 : vector<16x256xf32>
    %144 = arith.addf %139, %143 : vector<16x256xf32>
    %145 = vector.extract_strided_slice %78 {offsets = [208, 0], sizes = [16, 256], strides = [1, 1]} : vector<240x256xf32> to vector<16x256xf32>
    %c254_i32_30 = arith.constant 254 : i32
    %146 = tpu.dynamic_rotate %145 by %c254_i32_30 dim 1 : vector<16x256xf32>, i32 -> vector<16x256xf32>
    %147 = vector.broadcast %29 : vector<1x256xf32> to vector<16x256xf32>
    %148 = arith.mulf %146, %147 : vector<16x256xf32>
    %149 = arith.addf %144, %148 : vector<16x256xf32>
    %150 = vector.extract_strided_slice %78 {offsets = [224, 0], sizes = [16, 256], strides = [1, 1]} : vector<240x256xf32> to vector<16x256xf32>
    %c253_i32_31 = arith.constant 253 : i32
    %151 = tpu.dynamic_rotate %150 by %c253_i32_31 dim 1 : vector<16x256xf32>, i32 -> vector<16x256xf32>
    %152 = vector.broadcast %37 : vector<1x256xf32> to vector<16x256xf32>
    %153 = arith.mulf %151, %152 : vector<16x256xf32>
    %154 = arith.addf %149, %153 : vector<16x256xf32>
    %155 = vector.extract_strided_slice %79 {offsets = [32, 0], sizes = [16, 1], strides = [1, 1]} : vector<48x1xf32> to vector<16x1xf32>
    %156 = vector.broadcast %155 : vector<16x1xf32> to vector<16x256xf32>
    %157 = arith.addf %154, %156 : vector<16x256xf32>
    %cst_32 = arith.constant 0.000000e+00 : f32
    %158 = vector.broadcast %cst_32 : f32 to vector<16x256xf32>
    %159 = arith.maximumf %157, %158 : vector<16x256xf32>
    %160 = arith.truncf %159 : vector<16x256xf32> to vector<16x256xbf16>
    %161 = tpu.concatenate %96, %123, %160 in 0 : vector<16x256xbf16>, vector<16x256xbf16>, vector<16x256xbf16> -> vector<48x256xbf16>
    %c0_33 = arith.constant 0 : index
    %c0_34 = arith.constant 0 : index
    %162 = vector.load %arg4[%c0_33, %c0_34] : memref<16x48xbf16, #tpu.memory_space<vmem>>, vector<16x48xbf16>
    %cst_35 = arith.constant dense<0.000000e+00> : vector<16x256xf32>
    %163 = tpu.matmul %162, %161, %cst_35 {dimension_numbers = #tpu.dot_dimension_numbers<[1], [0], [0], [1], [0, 0, 1, 1], [], []>} : vector<16x48xbf16>, vector<48x256xbf16>, vector<16x256xf32> -> vector<16x256xf32>
    %c0_36 = arith.constant 0 : index
    %c0_37 = arith.constant 0 : index
    %164 = vector.load %arg7[%c0_36, %c0_37] : memref<16x3xf32, #tpu.memory_space<vmem>>, vector<16x3xf32>
    %165 = vector.extract_strided_slice %164 {offsets = [0, 0], sizes = [16, 1], strides = [1, 1]} : vector<16x3xf32> to vector<16x1xf32>
    %166 = vector.extract_strided_slice %164 {offsets = [0, 1], sizes = [16, 1], strides = [1, 1]} : vector<16x3xf32> to vector<16x1xf32>
    %167 = vector.extract_strided_slice %164 {offsets = [0, 2], sizes = [16, 1], strides = [1, 1]} : vector<16x3xf32> to vector<16x1xf32>
    %168 = vector.broadcast %165 : vector<16x1xf32> to vector<16x256xf32>
    %169 = arith.addf %163, %168 : vector<16x256xf32>
    %cst_38 = arith.constant 0.000000e+00 : f32
    %170 = vector.broadcast %cst_38 : f32 to vector<16x256xf32>
    %171 = arith.maximumf %169, %170 : vector<16x256xf32>
    %172 = vector.broadcast %166 : vector<16x1xf32> to vector<16x256xf32>
    %173 = arith.mulf %171, %172 : vector<16x256xf32>
    %174 = vector.broadcast %167 : vector<16x1xf32> to vector<16x256xf32>
    %175 = arith.addf %173, %174 : vector<16x256xf32>
    %c0_39 = arith.constant 0 : index
    %c0_40 = arith.constant 0 : index
    %176 = vector.load %arg8[%c0_39, %c0_40] : memref<16x256xf32, #tpu.memory_space<vmem>>, vector<16x256xf32>
    tpu.vector_store %arg8[%c0_39, %c0_40], %175 {strides = array<i32>} : memref<16x256xf32, #tpu.memory_space<vmem>>, vector<16x256xf32>,
    return
  }
  func.func @transform_0(%arg0: i32) -> (i32, i32) {
    %c0_i32 = arith.constant 0 : i32
    %c0_i32_0 = arith.constant 0 : i32
    return %c0_i32, %arg0 : i32, i32
  }
  func.func @transform_1(%arg0: i32) -> (i32, i32) {
    %c0_i32 = arith.constant 0 : i32
    %c0_i32_0 = arith.constant 0 : i32
    %c0_i32_1 = arith.constant 0 : i32
    return %c0_i32, %c0_i32_0 : i32, i32
  }
  func.func @transform_2(%arg0: i32) -> (i32, i32) {
    %c0_i32 = arith.constant 0 : i32
    %c0_i32_0 = arith.constant 0 : i32
    %c0_i32_1 = arith.constant 0 : i32
    return %c0_i32, %c0_i32_0 : i32, i32
  }
  func.func @transform_3(%arg0: i32) -> (i32, i32) {
    %c0_i32 = arith.constant 0 : i32
    %c0_i32_0 = arith.constant 0 : i32
    %c0_i32_1 = arith.constant 0 : i32
    return %c0_i32, %c0_i32_0 : i32, i32
  }
  func.func @transform_4(%arg0: i32) -> (i32, i32) {
    %c0_i32 = arith.constant 0 : i32
    %c0_i32_0 = arith.constant 0 : i32
    %c0_i32_1 = arith.constant 0 : i32
    return %c0_i32, %c0_i32_0 : i32, i32
  }
  func.func @transform_5(%arg0: i32) -> (i32, i32) {
    %c0_i32 = arith.constant 0 : i32
    %c0_i32_0 = arith.constant 0 : i32
    %c0_i32_1 = arith.constant 0 : i32
    return %c0_i32, %c0_i32_0 : i32, i32
  }
  func.func @transform_6(%arg0: i32) -> (i32, i32) {
    %c0_i32 = arith.constant 0 : i32
    %c0_i32_0 = arith.constant 0 : i32
    %c0_i32_1 = arith.constant 0 : i32
    return %c0_i32, %c0_i32_0 : i32, i32
  }
  func.func @transform_7(%arg0: i32) -> (i32, i32) {
    %c0_i32 = arith.constant 0 : i32
    %c0_i32_0 = arith.constant 0 : i32
    return %c0_i32, %arg0 : i32, i32
  }
}

</mosaic_0001>

<bundles_post_ra>
// kernel: spectral_feature_extractor.1
= control target key start
LH: loop header
LB: loop body
LE: loop exit
PB: predicated region body
PF: predicated region fallthrough
CT: control target
= control target key end

     0   :  { %s2402_s24 = smov 0   ;;  %s2404_s25 = smov 0   ;;  %s3513_s0 = inlined_call_operand.vmem [shape: f32[8,512], index: 0, kind: input, shape index: {}]   ;;  %s3514_s1 = inlined_call_operand.vmem [shape: bf16[192,56], index: 1, kind: input, shape index: {}]   ;;  %s3515_s2 = inlined_call_operand.vmem [shape: bf16[240,192], index: 2, kind: input, shape index: {}]   ;;  %s3516_s3 = inlined_call_operand.vmem [shape: bf16[16,48], index: 3, kind: input, shape index: {}]   ;;  %s3517_s4 = inlined_call_operand.vmem [shape: f32[192,3], index: 4, kind: input, shape index: {}]   ;;  %s3518_s5 = inlined_call_operand.vmem [shape: f32[48,1], index: 5, kind: input, shape index: {}]   ;;  %s3519_s6 = inlined_call_operand.vmem [shape: f32[16,3], index: 6, kind: input, shape index: {}]   ;;  %s3520_s7 = inlined_call_operand.vmem [shape: f32[16,512], index: 7, kind: output, shape index: {}]  }
   0x1   :  { %s2406_s26 = smov 0  }
   0x2 LB: > { %s2415_s27 = sadd.s32 4294967295, %s2350_s26   ;;  %s2417_s28 = sadd.s32 1, %s2350_s26   ;;  %s2350_s26 = sphi %s2406_s26, %s3644_s26   ;;  %s2346_s25 = sphi %s2404_s25, %s3643_s25   ;;  %s2342_s24 = sphi %s2402_s24, %s3642_s24  }
   0x3   : > { %s173_s29 = ssub.s32 %s2350_s26, %s2417_s28  ;;  %s176_s30 = sadd.s32 1, %s2346_s25 }
   0x4   : > { %p174_p0 = scmp.eq.s32.totalorder %s173_s29, 0  ;;  %p186_p1 = scmp.ne.s32.totalorder %s2346_s25, %s2342_s24 }
   0x5   : > { %p187_p2 = scmp.eq.s32.totalorder %s2415_s27, 1  ;;  %p2074_p3 = scmp.ge.s32.totalorder %s2350_s26, 1 }
   0x6   : > { %s2425_s8 = scalar_select %p174_p0, %s2346_s25, %s176_s30  }
   0x7   : > { %p2427_p4 = por %p187_p2, %p186_p1  ;;  %p238_p5 = scmp.lt.s32.totalorder %s2350_s26, 3 }
   0x9   : > { %p239_p6 = pnand %p2074_p3, %p238_p5 }
   0xb   : > { %242 = sbr.rel (%p239_p6) target bundleno = 1127 (0x467), region = 48 }
  0x10   : > { %s2076_s10 = sshll.u32 %s2415_s27, 1  ;;  %v3525_v0 = vmov 0   ;;  %s2353_s15 = smov 127   ;;  %v443_v3 = vld [vmem:[%s3517_s4 + $0x78] sm:$0xff]  ;;  %v442_v4 = vld [vmem:[%s3517_s4 + $0x70] sm:$0xff]  ;;  %v440_v5 = vld [vmem:[%s3517_s4 + $0x60] sm:$0xff]  ;;  %v279_v24 = vlaneseq }
  0x11   : > { %p270_p7 = scmp.lt.s32.totalorder %s2076_s10, 3  ;;  %2227 = vset.pattern.permute.xlu1 %v3525_v0  ;;  %2226 = vset.pattern.permute.xlu0 %v3525_v0  ;;  %s2354_s16 = smov 125   ;;  %v441_v6 = vld [vmem:[%s3517_s4 + $0x68] sm:$0xff]  ;;  %v438_v7 = vld [vmem:[%s3517_s4 + $0x50] sm:$0xff]  ;;  %v3523_v8 = vmov 1   ;;  %v436_v9 = vld [vmem:[%s3517_s4 + $0x40] sm:$0xff] }
  0x12   : > { %708 = vmatprep.mubr.bf16.mxu0 %v3525_v0  ;;  %s2355_s17 = smov 126   ;;  %s2356_s18 = smov 1   ;;  %v3521_v10 = vmov 2   ;;  %v2489_v11 = vld [vmem:[%s3517_s4 + $0x30] sm:$0xff]  ;;  %v2495_v12 = vld [vmem:[%s3517_s4 + $0x20] sm:$0xff]  ;;  %v439_v13 = vld [vmem:[%s3517_s4 + $0x58] sm:$0xff] }
  0x13   : > { %s3646_s10 = smov (!%p270_p7, %s2076_s10), 3  ;;  %s2357_s19 = smov 3   ;;  %v2504_v14 = vld [vmem:[%s3517_s4 + $0x10] sm:$0xff]  ;;  %v2511_v15 = vld [vmem:[%s3517_s4] sm:$0xff]  ;;  %v437_v19 = vld [vmem:[%s3517_s4 + $0x48] sm:$0xff]  ;;  %v2571_v26 = vand.u32 127, %v279_v24 }
  0x14   : > { %s2077_s11 = sshll.u32 %s3646_s10, 3  ;;  %s2358_s22 = smov 2   ;;  %v2518_v16 = vld [vmem:[%s3517_s4 + $0xb0] sm:$0xff]  ;;  %v2525_v17 = vld [vmem:[%s3517_s4 + $0xa0] sm:$0xff]  ;;  %v435_v21 = vld [vmem:[%s3517_s4 + $0x38] sm:$0xff]  ;;  %v2361_v35 = vmov 0.0  }
  0x15   : > { %s273_s14 = scalar_lea.vmem %s3513_s0, %s2077_s11  ;;  %v2531_v18 = vld [vmem:[%s3517_s4 + $0x90] sm:$0xff]  ;;  %v2541_v20 = vld [vmem:[%s3517_s4 + $0x80] sm:$0xff]  ;;  %v2555_v22 = vld [vmem:[%s3517_s4 + $0x28] sm:$0xff]  ;;  %3573 = vst [vmem:[#allocation3_spill] sm:$0xff] %v2571_v26  ;;  %v281_v28 = vadd.s32 128, %v2571_v26  ;;  %v2591_v30 = vand.u32 31, %v2571_v26 }
  0x16   : > { %v2438_v1 = vld [vmem:[%s273_s14] sm:$0xff]  ;;  %v2444_v2 = vld [vmem:[%s273_s14 + $0x8] sm:$0xff]  ;;  %v2562_v23 = vld [vmem:[%s3517_s4 + $0x18] sm:$0xff]  ;;  %vm391_vm2 = vcmp.lt.s32.totalorder %v2571_v26, 125  ;;  %vm373_vm4 = vcmp.lt.s32.totalorder %v2571_v26, 127  ;;  %vm382_vm8 = vcmp.lt.s32.totalorder %v2571_v26, 126 }
  0x17   : > { %369 = vrot.lane.b32.xlu1 %v2438_v1, %s2353_s15  ;;  %387 = vrot.lane.b32.xlu0 %v2438_v1, %s2354_s16  ;;  %v2568_v25 = vld [vmem:[%s3517_s4 + $0x8] sm:$0xff]  ;;  %v2578_v27 = vld [vmem:[%s3517_s4 + $0xb8] sm:$0xff]  ;;  %v2593_v31 = vand.u32 31, %v281_v28  ;;  %vm330_vm1 = vcmp.lt.s32.totalorder %v2591_v30, 29  ;;  %vm306_vm3 = vcmp.lt.s32.totalorder %v2591_v30, 31  ;;  %vm318_vm6 = vcmp.lt.s32.totalorder %v2591_v30, 30 }
  0x18   : > { %v2586_v29 = vld [vmem:[%s3517_s4 + $0xa8] sm:$0xff]  ;;  %v2598_v32 = vld [vmem:[%s3517_s4 + $0x98] sm:$0xff]  ;;  %v2612_v37 = vsel %vm330_vm1, 1.0, %v2361_v35  ;;  %vm669_vm9 = vcmask 1043456   ;;  %v2626_v42 = vsel %vm306_vm3, 1.0, %v2361_v35  ;;  %v2638_v48 = vsel %vm318_vm6, 1.0, %v2361_v35 }
  0x19   : > { %vm331_vm0 = vcmp.lt.s32.totalorder %v2593_v31, 29  ;;  %3575 = vst [vmem:[#allocation5_spill] sm:$0xff] %v2612_v37  ;;  %vm307_vm5 = vcmp.lt.s32.totalorder %v2593_v31, 31  ;;  %vm319_vm7 = vcmp.lt.s32.totalorder %v2593_v31, 30  ;;  %3576 = vst [vmem:[#allocation6_spill] sm:$0xff] %v2626_v42  ;;  %vm312_vm10 = vcmp.ge.s32.totalorder %v2591_v30, 1 }
  0x1a   : > { %v2609_v36 = vsel %vm331_vm0, 1.0, %v2361_v35  ;;  %v2633_v46 = vsel %vm307_vm5, 1.0, %v2361_v35  ;;  %3578 = vst [vmem:[#allocation8_spill] sm:$0xff] %v2638_v48  ;;  %v2641_v49 = vsel %vm319_vm7, 1.0, %v2361_v35  ;;  %vm313_vm11 = vcmp.ge.s32.totalorder %v2593_v31, 1  ;;  %s266_s21 = sand.u32 1, %s2342_s24  }
  0x1b   : > { %371 = vrot.lane.b32.xlu1 %v2444_v2, %s2353_s15  ;;  %389 = vrot.lane.b32.xlu0 %v2444_v2, %s2354_s16  ;;  %3574 = vst [vmem:[#allocation4_spill] sm:$0xff] %v2609_v36  ;;  %3577 = vst [vmem:[#allocation7_spill] sm:$0xff] %v2633_v46  ;;  %vm364_vm12 = vcmp.lt.s32.totalorder %v2571_v26, 1  ;;  %v2661_v61 = vsel %vm312_vm10, 1.0, %v2361_v35  ;;  %v2664_v62 = vsel %vm313_vm11, 1.0, %v2361_v35  ;;  %vm336_vm13 = vcmp.ge.s32.totalorder %v2591_v30, 3 }
  0x1c   : > { %3579 = vst [vmem:[#allocation9_spill] sm:$0xff] %v2641_v49  ;;  %3580 = vst [vmem:[#allocation10_spill] sm:$0xff] %v2661_v61  ;;  %vm337_vm14 = vcmp.ge.s32.totalorder %v2593_v31, 3  ;;  %vm346_vm15 = vcmp.lt.s32.totalorder %v2571_v26, 3  ;;  %vm324_vm0 = vcmp.ge.s32.totalorder %v2591_v30, 2  ;;  %vm325_vm1 = vcmp.ge.s32.totalorder %v2593_v31, 2 }
  0x1d   : > { %3581 = vst [vmem:[#allocation11_spill] sm:$0xff] %v2664_v62  ;;  %v2683_v24 = vsel %vm336_vm13, 1.0, %v2361_v35  ;;  %v2686_v28 = vsel %vm337_vm14, 1.0, %v2361_v35  ;;  %vm355_vm3 = vcmp.lt.s32.totalorder %v2571_v26, 2  ;;  %v2695_v30 = vsel %vm324_vm0, 1.0, %v2361_v35  ;;  %s2075_s23 = sshll.u32 %s266_s21, 5 }
  0x1e   : > { %3582 = vst [vmem:[#allocation12_spill] sm:$0xff] %v2683_v24  ;;  %3583 = vst [vmem:[#allocation13_spill] sm:$0xff] %v2686_v28  ;;  %v2698_v31 = vsel %vm325_vm1, 1.0, %v2361_v35  ;;  %vm632_vm5 = vcmask 457728   ;;  %vm1354_vm6 = vcmask 523264   ;;  %s268_s26 = scalar_lea.vmem [#allocation2], %s2075_s23 }
  0x1f   : > { %380 = vrot.lane.b32.xlu1 %v2444_v2, %s2355_s17  ;;  %378 = vrot.lane.b32.xlu0 %v2438_v1, %s2355_s17  ;;  %3584 = vst [vmem:[#allocation14_spill] sm:$0xff] %v2695_v30  ;;  %3585 = vst [vmem:[#allocation15_spill] sm:$0xff] %v2698_v31  ;;  %s2167_s24 = sshll.u32 (%p2427_p4), %s2415_s27, 4 }
  0x20   : > { %s1996_s10 = scalar_lea.vmem (%p2427_p4), %s3520_s7, %s2167_s24 }
  0x23   : > { %362 = vrot.lane.b32.xlu1 %v2444_v2, %s2356_s18  ;;  %360 = vrot.lane.b32.xlu0 %v2438_v1, %s2356_s18 }
  0x27   : > { %344 = vrot.lane.b32.xlu1 %v2444_v2, %s2357_s19  ;;  %342 = vrot.lane.b32.xlu0 %v2438_v1, %s2357_s19 }
  0x2b   : > { %353 = vrot.lane.b32.xlu1 %v2444_v2, %s2358_s22  ;;  %351 = vrot.lane.b32.xlu0 %v2438_v1, %s2358_s22 }
  0x2f   : > { %529 = vperm.xlu1 %2227, %v443_v3   ;;  %524 = vperm.xlu0 %2226, %v442_v4  }
  0x33   : > { %514 = vperm.xlu1 %2227, %v440_v5   ;;  %519 = vperm.xlu0 %2226, %v441_v6  }
  0x37   : > { %2228 = vset.pattern.permute.xlu1 %v3523_v8  ;;  %504 = vperm.xlu0 %2226, %v438_v7  }
  0x38   : > { %934 = vperm.xlu1 %2228, %v442_v4  }
  0x3b   : > { %494 = vperm.xlu0 %2226, %v436_v9  }
  0x3c   : > { %2229 = vset.pattern.permute.xlu1 %v3521_v10 }
  0x3d   : > { %1078 = vperm.xlu1 %2229, %v442_v4  }
  0x3f   : > { %484 = vperm.xlu0 %2226, %v2489_v11  }
  0x41   : > { %1082 = vperm.xlu1 %2229, %v443_v3  }
  0x43   : > { %474 = vperm.xlu0 %2226, %v2495_v12  }
  0x45   : > { %2230 = vset.pattern.permute.xlu1 %v3525_v0 }
  0x46   : > { %509 = vperm.xlu1 %2230, %v439_v13  }
  0x47   : > { %464 = vperm.xlu0 %2226, %v2504_v14  }
  0x4a   : > { %2231 = vset.pattern.permute.xlu1 %v3523_v8 }
  0x4b   : > { %926 = vperm.xlu1 %2231, %v440_v5   ;;  %454 = vperm.xlu0 %2226, %v2511_v15  }
  0x4f   : > { %2232 = vset.pattern.permute.xlu1 %v3521_v10  ;;  %564 = vperm.xlu0 %2226, %v2518_v16  }
  0x50   : > { %1070 = vperm.xlu1 %2232, %v440_v5  }
  0x53   : > { %554 = vperm.xlu0 %2226, %v2525_v17  }
  0x54   : > { %1074 = vperm.xlu1 %2232, %v441_v6  }
  0x57   : > { %544 = vperm.xlu0 %2226, %v2531_v18  }
  0x58   : > { %2233 = vset.pattern.permute.xlu1 %v3525_v0 }
  0x59   : > { %499 = vperm.xlu1 %2233, %v437_v19  }
  0x5b   : > { %534 = vperm.xlu0 %2226, %v2541_v20  }
  0x5d   : > { %2234 = vset.pattern.permute.xlu1 %v3523_v8 }
  0x5e   : > { %918 = vperm.xlu1 %2234, %v438_v7  }
  0x5f   : > { %2257 = vset.pattern.permute.xlu0 %v3523_v8 }
  0x60   : > { %938 = vperm.xlu0 %2257, %v443_v3  }
  0x62   : > { %2235 = vset.pattern.permute.xlu1 %v3521_v10 }
  0x63   : > { %1062 = vperm.xlu1 %2235, %v438_v7  }
  0x64   : > { %930 = vperm.xlu0 %2257, %v441_v6  }
  0x67   : > { %1066 = vperm.xlu1 %2235, %v439_v13  }
  0x68   : > { %922 = vperm.xlu0 %2257, %v439_v13  }
  0x6b   : > { %2236 = vset.pattern.permute.xlu1 %v3525_v0 }
  0x6c   : > { %489 = vperm.xlu1 %2236, %v435_v21   ;;  %914 = vperm.xlu0 %2257, %v437_v19  }
  0x70   : > { %2237 = vset.pattern.permute.xlu1 %v3523_v8  ;;  %906 = vperm.xlu0 %2257, %v435_v21  }
  0x71   : > { %910 = vperm.xlu1 %2237, %v436_v9  }
  0x74   : > { %898 = vperm.xlu0 %2257, %v2555_v22  }
  0x75   : > { %2238 = vset.pattern.permute.xlu1 %v3521_v10 }
  0x76   : > { %1054 = vperm.xlu1 %2238, %v436_v9  }
  0x78   : > { %890 = vperm.xlu0 %2257, %v2562_v23  }
  0x7a   : > { %1058 = vperm.xlu1 %2238, %v437_v19  }
  0x7c   : > { %882 = vperm.xlu0 %2257, %v2568_v25  }
  0x7e   : > { %2239 = vset.pattern.permute.xlu1 %v3525_v0 }
  0x7f   : > { %479 = vperm.xlu1 %2239, %v2555_v22  }
  0x80   : > { %970 = vperm.xlu0 %2257, %v2578_v27  }
  0x83   : > { %2240 = vset.pattern.permute.xlu1 %v3523_v8 }
  0x84   : > { %902 = vperm.xlu1 %2240, %v2489_v11   ;;  %962 = vperm.xlu0 %2257, %v2586_v29  }
  0x88   : > { %2241 = vset.pattern.permute.xlu1 %v3521_v10  ;;  %954 = vperm.xlu0 %2257, %v2598_v32  }
  0x89   : > { %v370_v33 = vpop.permute.xlu1 %369  ;;  %v388_v34 = vpop.permute.xlu0 %387  ;;  %1046 = vperm.xlu1 %2241, %v2489_v11  }
  0x8c   : > { %942 = vperm.xlu0 %2257, %v2541_v20  }
  0x8d   : > { %v372_v38 = vpop.permute.xlu1 %371  ;;  %v390_v39 = vpop.permute.xlu0 %389  ;;  %1050 = vperm.xlu1 %2241, %v435_v21  }
  0x8e   : > { %v392_v40 = vsel %vm391_vm2, %v388_v34, %v390_v39  ;;  %v393_v41 = vsel %vm391_vm2, %v390_v39, %v388_v34  ;;  %v374_v43 = vsel %vm373_vm4, %v370_v33, %v372_v38  ;;  %v375_v47 = vsel %vm373_vm4, %v372_v38, %v370_v33 }
  0x8f   : > { %v395_v44 = vmul.f32 %v2609_v36, %v393_v41  ;;  %v394_v45 = vmul.f32 %v2612_v37, %v392_v40  ;;  %v376_v54 = vmul.f32 %v2626_v42, %v374_v43  ;;  %v377_v57 = vmul.f32 %v2633_v46, %v375_v47 }
  0x90   : > { %2262 = vset.pattern.permute.xlu0 %v3521_v10 }
  0x91   : > { %v381_v50 = vpop.permute.xlu1 %380  ;;  %v379_v51 = vpop.permute.xlu0 %378  ;;  %v403_v52 = vpack.c.bf16 %v395_v44, %v395_v44  ;;  %v402_v53 = vpack.c.bf16 %v394_v45, %v394_v45  ;;  %2242 = vset.pattern.permute.xlu1 %v3525_v0  ;;  %1086 = vperm.xlu0 %2262, %v2541_v20   ;;  %v2270_v45 = vld [vmem:[%s3514_s1] sm:$0xff]  }
  0x92   : > { %v383_v55 = vsel %vm382_vm8, %v379_v51, %v381_v50  ;;  %v384_v56 = vsel %vm382_vm8, %v381_v50, %v379_v51  ;;  %469 = vperm.xlu1 %2242, %v2562_v23   ;;  %v2272_v50 = vld [vmem:[%s3514_s1 + $0x10] sm:$0xff]  }
  0x93   : > { %v385_v58 = vmul.f32 %v2638_v48, %v383_v55  ;;  %v386_v59 = vmul.f32 %v2641_v49, %v384_v56  ;;  %2102 = vmatprep.subr.msk.bf16.mxu0 %vm669_vm9, %v403_v52  ;;  %v671_v60 = vsel %vm669_vm9, %v402_v53, 0  ;;  %v2274_v53 = vld [vmem:[%s3514_s1 + $0x20] sm:$0xff]   ;;  %v2275_v55 = vld [vmem:[%s3514_s1 + $0x28] sm:$0xff]  }
  0x94   : > { %685 = vmatpush1.bf16.msra.mxu0 %v671_v60  ;;  %v2279_v60 = vld [vmem:[%s3514_s1 + $0x48] sm:$0xff]  }
  0x95   : > { %v363_v63 = vpop.permute.xlu1 %362  ;;  %v361_v3 = vpop.permute.xlu0 %360  ;;  %v401_v4 = vpack.c.bf16 %v386_v59, %v377_v57  ;;  %v400_v5 = vpack.c.bf16 %v385_v58, %v376_v54  ;;  %2265 = vset.pattern.permute.xlu0 %v3525_v0  ;;  %v2277_v58 = vld [vmem:[%s3514_s1 + $0x38] sm:$0xff]  }
  0x96   : > { %v365_v6 = vsel %vm364_vm12, %v361_v3, %v363_v63  ;;  %v366_v7 = vsel %vm364_vm12, %v363_v63, %v361_v3  ;;  %2243 = vset.pattern.permute.xlu1 %v3523_v8  ;;  %v445_v3 = vld [vmem:[%s3517_s4 + $0x88] sm:$0xff] }
  0x97   : > { %v367_v9 = vmul.f32 %v2661_v61, %v366_v7  ;;  %v368_v11 = vmul.f32 %v2664_v62, %v365_v6  ;;  %686 = vmatprep.subr.bf16.mxu0 %v401_v4  ;;  %894 = vperm.xlu1 %2243, %v2495_v12  }
  0x98   : > { %687 = vmatpush1.bf16.msra.mxu0 %v400_v5  ;;  %v2281_v5 = vld [vmem:[%s3514_s1 + $0x58] sm:$0xff]  }
  0x99   : > { %v345_v13 = vpop.permute.xlu1 %344  ;;  %v343_v19 = vpop.permute.xlu0 %342  ;;  %v399_v20 = vpack.c.bf16 %v2444_v2, %v368_v11  ;;  %v398_v21 = vpack.c.bf16 %v2438_v1, %v367_v9 }
  0x9a   : > { %v347_v2 = vsel %vm346_vm15, %v343_v19, %v345_v13  ;;  %v348_v1 = vsel %vm346_vm15, %v345_v13, %v343_v19 }
  0x9b   : > { %688 = vmatprep.subr.bf16.mxu0 %v399_v20  ;;  %2244 = vset.pattern.permute.xlu1 %v3521_v10  ;;  %v349_v40 = vmul.f32 %v2683_v24, %v348_v1  ;;  %v350_v41 = vmul.f32 %v2686_v28, %v347_v2 }
  0x9c   : > { %689 = vmatpush1.bf16.msra.mxu0 %v398_v21  ;;  %1038 = vperm.xlu1 %2244, %v2495_v12  }
  0x9d   : > { %v354_v33 = vpop.permute.xlu1 %353  ;;  %v352_v34 = vpop.permute.xlu0 %351 }
  0x9e   : > { %v356_v38 = vsel %vm355_vm3, %v352_v34, %v354_v33  ;;  %v357_v39 = vsel %vm355_vm3, %v354_v33, %v352_v34 }
  0x9f   : > { %v358_v43 = vmul.f32 %v2695_v30, %v357_v39  ;;  %v359_v44 = vmul.f32 %v2698_v31, %v356_v38 }
  0xa0   : > { %1042 = vperm.xlu1 %2244, %v2555_v22   ;;  %v2271_v22 = vld [vmem:[%s3514_s1 + $0x8] sm:$0xff]  }
  0xa1   : > { %v397_v35 = vpack.c.bf16 %v359_v44, %v350_v41  ;;  %v396_v12 = vpack.c.bf16 %v358_v43, %v349_v40 }
  0xa3   : > { %690 = vmatprep.subr.bf16.mxu0 %v397_v35 }
  0xa4   : > { %691 = vmatpush1.bf16.msra.mxu0 %v396_v12  ;;  %2245 = vset.pattern.permute.xlu1 %v3525_v0 }
  0xa5   : > { %459 = vperm.xlu1 %2245, %v2568_v25  }
  0xa7   : > { %2103 = vmatmul.mubr.msk.bf16.vlgmr.msra.gmra.mxu0 %vm632_vm5, %v2270_v45 }
  0xa8   : > { %718 = vmatprep.mubr.bf16.mxu0 %v3525_v0 }
  0xa9   : > { %2246 = vset.pattern.permute.xlu1 %v3523_v8 }
  0xaa   : > { %886 = vperm.xlu1 %2246, %v2504_v14   ;;  %v2725_v47 = vpop.permute.xlu1 %529  ;;  %v2829_v6 = vpop.permute.xlu0 %524 }
  0xae   : > { %2247 = vset.pattern.permute.xlu1 %v3521_v10  ;;  %v2732_v51 = vpop.permute.xlu1 %514  ;;  %v2836_v9 = vpop.permute.xlu0 %519 }
  0xaf   : > { %2104 = vmatmul.mubr.msk.bf16.gmra.mxu0 %vm632_vm5, %v2271_v22  ;;  %1030 = vperm.xlu1 %2247, %v2504_v14   ;;  %v2273_v14 = vld [vmem:[%s3514_s1 + $0x18] sm:$0xff]  }
  0xb0   : > { %728 = vmatprep.mubr.bf16.mxu0 %v3525_v0 }
  0xb2   : > { %v2841_v13 = vpop.permute.xlu0 %504 }
  0xb3   : > { %1034 = vperm.xlu1 %2247, %v2562_v23   ;;  %v2741_v52 = vpop.permute.xlu1 %934 }
  0xb7   : > { %2105 = vmatmul.mubr.msk.bf16.gmra.mxu0 %vm632_vm5, %v2272_v50  ;;  %2248 = vset.pattern.permute.xlu1 %v3525_v0 }
  0xb8   : > { %738 = vmatprep.mubr.bf16.mxu0 %v3525_v0  ;;  %569 = vperm.xlu1 %2248, %v2578_v27   ;;  %v2748_v23 = vpop.permute.xlu1 %1078 }
  0xbc   : > { %2249 = vset.pattern.permute.xlu1 %v3523_v8  ;;  %v2756_v54 = vpop.permute.xlu1 %1082 }
  0xbd   : > { %878 = vperm.xlu1 %2249, %v2511_v15  }
  0xbf   : > { %2106 = vmatmul.mubr.msk.bf16.gmra.mxu0 %vm632_vm5, %v2273_v14 }
  0xc0   : > { %748 = vmatprep.mubr.bf16.mxu0 %v3525_v0 }
  0xc1   : > { %2250 = vset.pattern.permute.xlu1 %v3521_v10 }
  0xc2   : > { %1022 = vperm.xlu1 %2250, %v2511_v15   ;;  %v2764_v15 = vpop.permute.xlu1 %509 }
  0xc6   : > { %1026 = vperm.xlu1 %2250, %v2568_v25   ;;  %v2276_v25 = vld [vmem:[%s3514_s1 + $0x30] sm:$0xff]   ;;  %v2773_v56 = vpop.permute.xlu1 %926 }
  0xc7   : > { %2107 = vmatmul.mubr.msk.bf16.gmra.mxu0 %vm632_vm5, %v2274_v53 }
  0xc8   : > { %758 = vmatprep.mubr.bf16.mxu0 %v3525_v0 }
  0xca   : > { %2251 = vset.pattern.permute.xlu1 %v3525_v0 }
  0xcb   : > { %559 = vperm.xlu1 %2251, %v2586_v29   ;;  %v2780_v57 = vpop.permute.xlu1 %1070 }
  0xcf   : > { %2108 = vmatmul.mubr.msk.bf16.gmra.mxu0 %vm632_vm5, %v2275_v55  ;;  %2252 = vset.pattern.permute.xlu1 %v3523_v8  ;;  %v2788_v59 = vpop.permute.xlu1 %1074 }
  0xd0   : > { %768 = vmatprep.mubr.bf16.mxu0 %v3525_v0  ;;  %966 = vperm.xlu1 %2252, %v2518_v16  }
  0xd4   : > { %2253 = vset.pattern.permute.xlu1 %v3521_v10 }
  0xd5   : > { %1110 = vperm.xlu1 %2253, %v2518_v16   ;;  %v2278_v16 = vld [vmem:[%s3514_s1 + $0x40] sm:$0xff]  }
  0xd7   : > { %2109 = vmatmul.mubr.msk.bf16.gmra.mxu0 %vm632_vm5, %v2276_v25 }
  0xd8   : > { %778 = vmatprep.mubr.bf16.mxu0 %v3525_v0 }
  0xd9   : > { %1114 = vperm.xlu1 %2253, %v2578_v27   ;;  %v2796_v27 = vpop.permute.xlu1 %499 }
  0xdd   : > { %2254 = vset.pattern.permute.xlu1 %v3525_v0  ;;  %v2805_v63 = vpop.permute.xlu1 %918 }
  0xde   : > { %549 = vperm.xlu1 %2254, %v2598_v32  }
  0xdf   : > { %2110 = vmatmul.mubr.msk.bf16.gmra.mxu0 %vm632_vm5, %v2277_v58 }
  0xe0   : > { %788 = vmatprep.mubr.bf16.mxu0 %v3525_v0 }
  0xe1   : > { %v2814_v4 = vpop.permute.xlu1 %1062 }
  0xe2   : > { %2255 = vset.pattern.permute.xlu1 %v3523_v8 }
  0xe3   : > { %958 = vperm.xlu1 %2255, %v2525_v17  }
  0xe7   : > { %2111 = vmatmul.mubr.msk.bf16.gmra.mxu0 %vm632_vm5, %v2278_v16  ;;  %2256 = vset.pattern.permute.xlu1 %v3521_v10 }
  0xe8   : > { %798 = vmatprep.mubr.bf16.mxu0 %v3525_v0  ;;  %1102 = vperm.xlu1 %2256, %v2525_v17   ;;  %v2280_v17 = vld [vmem:[%s3514_s1 + $0x50] sm:$0xff]  }
  0xec   : > { %1106 = vperm.xlu1 %2256, %v2586_v29   ;;  %v2822_v29 = vpop.permute.xlu1 %1066 }
  0xef   : > { %2112 = vmatmul.mubr.msk.bf16.gmra.mxu0 %vm632_vm5, %v2279_v60 }
  0xf0   : > { %808 = vmatprep.mubr.bf16.mxu0 %v3525_v0  ;;  %2258 = vset.pattern.permute.xlu1 %v3525_v0  ;;  %v2832_v7 = vpop.permute.xlu1 %489 }
  0xf1   : > { %539 = vperm.xlu1 %2258, %v445_v3  }
  0xf4   : > { %v2838_v11 = vpop.permute.xlu1 %910 }
  0xf5   : > { %2259 = vset.pattern.permute.xlu1 %v3523_v8 }
  0xf6   : > { %950 = vperm.xlu1 %2259, %v2531_v18  }
  0xf7   : > { %2113 = vmatmul.mubr.msk.bf16.gmra.mxu0 %vm632_vm5, %v2280_v17 }
  0xf8   : > { %818 = vmatprep.mubr.bf16.mxu0 %v3525_v0  ;;  %v2844_v19 = vpop.permute.xlu1 %1054 }
  0xf9   : > { %3586 = vst [vmem:[#allocation16_spill] sm:$0xff] %v2844_v19 }
  0xfa   : > { %2260 = vset.pattern.permute.xlu1 %v3521_v10 }
  0xfb   : > { %1094 = vperm.xlu1 %2260, %v2531_v18   ;;  %v2846_v18 = vpop.permute.xlu0 %494 }
  0xfc   : > { %v2849_v20 = vpop.permute.xlu1 %1058 }
  0xfd   : > { %3587 = vst [vmem:[#allocation17_spill] sm:$0xff] %v2849_v20 }
  0xff   : > { %2114 = vmatmul.mubr.msk.bf16.gmra.mxu0 %vm632_vm5, %v2281_v5  ;;  %1098 = vperm.xlu1 %2260, %v2598_v32   ;;  %v2851_v32 = vpop.permute.xlu0 %484  ;;  %v2284_v5 = vld [vmem:[%s3515_s2 + $0x4] ss:$8 sps:$4 sm:$0xff]  }
 0x100   : > { %v2853_v21 = vpop.permute.xlu1 %479  ;;  %2145 = vmatprep.mubr.msk.bf16.mxu0 %vm1354_vm6, %v2284_v5 }
 0x103   : > { %2261 = vset.pattern.permute.xlu1 %v3523_v8  ;;  %v2855_v2 = vpop.permute.xlu0 %474 }
 0x104   : > { %946 = vperm.xlu1 %2261, %v445_v3   ;;  %v2857_v1 = vpop.permute.xlu1 %902 }
 0x105   : > { %3588 = vst [vmem:[#allocation18_spill] sm:$0xff] %v2857_v1 }
 0x107   : > { %v465_v33 = vpop.permute.xlu0 %464 }
 0x108   : > { %2263 = vset.pattern.permute.xlu1 %v3521_v10  ;;  %v2859_v34 = vpop.permute.xlu1 %1046  ;;  %v2287_v10 = vld [vmem:[%s3515_s2 + $0x34] ss:$8 sps:$4 sm:$0xff]  }
 0x109   : > { %1090 = vperm.xlu1 %2263, %v445_v3   ;;  %3589 = vst [vmem:[#allocation19_spill] sm:$0xff] %v2859_v34  ;;  %2148 = vmatprep.mubr.msk.bf16.mxu1 %vm1354_vm6, %v2287_v10 }
 0x10b   : > { %v455_v38 = vpop.permute.xlu0 %454 }
 0x10c   : > { %v2861_v39 = vpop.permute.xlu1 %1050 }
 0x10d   : > { %2264 = vset.pattern.permute.xlu1 %v3525_v0  ;;  %3590 = vst [vmem:[#allocation20_spill] sm:$0xff] %v2861_v39 }
 0x10f   : > { %v2863_v40 = vpop.permute.xlu0 %564 }
 0x110   : > { %3591 = vst [vmem:[#allocation21_spill] sm:$0xff] %v2863_v40  ;;  %v470_v41 = vpop.permute.xlu1 %469 }
 0x113   : > { %v2865_v43 = vpop.permute.xlu0 %554 }
 0x114   : > { %3592 = vst [vmem:[#allocation22_spill] sm:$0xff] %v2865_v43  ;;  %v2867_v44 = vpop.permute.xlu1 %894 }
 0x117   : > { %v2869_v35 = vpop.permute.xlu0 %544 }
 0x118   : > { %3593 = vst [vmem:[#allocation23_spill] sm:$0xff] %v2869_v35  ;;  %v2871_v12 = vpop.permute.xlu1 %1038 }
 0x11b   : > { %v2873_v45 = vpop.permute.xlu0 %534 }
 0x11c   : > { %3594 = vst [vmem:[#allocation24_spill] sm:$0xff] %v2873_v45  ;;  %v2875_v22 = vpop.permute.xlu1 %1042 }
 0x11f   : > { %v2877_v50 = vpop.permute.xlu0 %938 }
 0x120   : > { %v460_v14 = vpop.permute.xlu1 %459 }
 0x123   : > { %v2879_v53 = vpop.permute.xlu0 %930 }
 0x125   : > { %v887_v55 = vpop.permute.xlu1 %886 }
 0x127   : > { %v2881_v25 = vpop.permute.xlu0 %922 }
 0x12a   : > { %v2883_v58 = vpop.permute.xlu1 %1030 }
 0x12b   : > { %v2885_v16 = vpop.permute.xlu0 %914 }
 0x12e   : > { %v1035_v60 = vpop.permute.xlu1 %1034 }
 0x12f   : > { %v2887_v3 = vpop.permute.xlu0 %906 }
 0x133   : > { %v2889_v17 = vpop.permute.xlu1 %569  ;;  %v2897_v8 = vpop.permute.xlu0 %898 }
 0x134   : > { %3595 = vst [vmem:[#allocation25_spill] sm:$0xff] %v2889_v17 }
 0x137   : > { %v891_v37 = vpop.permute.xlu0 %890 }
 0x138   : > { %v879_v0 = vpop.permute.xlu1 %878 }
 0x13b   : > { %v883_v30 = vpop.permute.xlu0 %882 }
 0x13d   : > { %v1023_v49 = vpop.permute.xlu1 %1022 }
 0x141   : > { %v1027_v5 = vpop.permute.xlu1 %1026 }
 0x167   : > { %v710_v36 = vpop.f32.mrf.mxu0 }
 0x168   : > { %v711_v28 = vadd.f32 %v710_v36, %v455_v38 }
 0x169   : > { %v712_v24 = vpop.f32.mrf.mxu0 }
 0x16a   : > { %v829_v48 = vmax.f32 %v711_v28, 0.0  ;;  %v713_v46 = vadd.f32 %v712_v24, %v455_v38 }
 0x16b   : > { %v714_v42 = vpop.f32.mrf.mxu0 }
 0x16c   : > { %v830_v62 = vmax.f32 %v713_v46, 0.0  ;;  %v715_v61 = vadd.f32 %v714_v42, %v460_v14  ;;  %v973_v26 = vmul.f32 %v879_v0, %v829_v48 }
 0x16d   : > { %v716_v31 = vpop.f32.mrf.mxu0 }
 0x16e   : > { %v831_v45 = vmax.f32 %v715_v61, 0.0  ;;  %v717_v35 = vadd.f32 %v716_v31, %v460_v14  ;;  %v974_v43 = vmul.f32 %v879_v0, %v830_v62  ;;  %v1117_v36 = vadd.f32 %v1023_v49, %v973_v26 }
 0x16f   : > { %v720_v17 = vpop.f32.mrf.mxu0 }
 0x170   : > { %v832_v10 = vmax.f32 %v717_v35, 0.0  ;;  %v721_v40 = vadd.f32 %v720_v17, %v465_v33  ;;  %v975_v34 = vmul.f32 %v883_v30, %v831_v45  ;;  %v1118_v46 = vadd.f32 %v1023_v49, %v974_v43 }
 0x171   : > { %v722_v39 = vpop.f32.mrf.mxu0 }
 0x172   : > { %v976_v19 = vmul.f32 %v883_v30, %v832_v10  ;;  %v1119_v1 = vadd.f32 %v1027_v5, %v975_v34  ;;  %v723_v28 = vadd.f32 %v722_v39, %v465_v33  ;;  %v833_v24 = vmax.f32 %v721_v40, 0.0 }
 0x173   : > { %v724_v38 = vpop.f32.mrf.mxu0 }
 0x174   : > { %v1120_v42 = vadd.f32 %v1027_v5, %v976_v19  ;;  %v2901_v20 = vpack.c.bf16 %v1119_v1, %v1117_v36  ;;  %v834_v48 = vmax.f32 %v723_v28, 0.0  ;;  %v725_v61 = vadd.f32 %v724_v38, %v470_v41 }
 0x175   : > { %v726_v31 = vpop.f32.mrf.mxu0  ;;  %v977_v62 = vmul.f32 %v887_v55, %v833_v24 }
 0x176   : > { %3596 = vst [vmem:[#allocation26_spill] sm:$0xff] %v2901_v20  ;;  %v2903_v14 = vpack.c.bf16 %v1120_v42, %v1118_v46  ;;  %v727_v0 = vadd.f32 %v726_v31, %v470_v41  ;;  %v835_v35 = vmax.f32 %v725_v61, 0.0  ;;  %v978_v30 = vmul.f32 %v887_v55, %v834_v48  ;;  %v2923_v31 = vpop.permute.xlu1 %559 }
 0x177   : > { %v730_v45 = vpop.f32.mrf.mxu0  ;;  %v1121_v1 = vadd.f32 %v2883_v58, %v977_v62 }
 0x178   : > { %3597 = vst [vmem:[#allocation27_spill] sm:$0xff] %v2903_v14  ;;  %v836_v17 = vmax.f32 %v727_v0, 0.0  ;;  %v731_v26 = vadd.f32 %v730_v45, %v2855_v2  ;;  %v979_v33 = vmul.f32 %v891_v37, %v835_v35  ;;  %v1122_v41 = vadd.f32 %v2883_v58, %v978_v30 }
 0x179   : > { %v2906_v34 = vpop.f32.mrf.mxu0 }
 0x17a   : > { %v980_v49 = vmul.f32 %v891_v37, %v836_v17  ;;  %v837_v19 = vmax.f32 %v731_v26, 0.0  ;;  %v1123_v39 = vadd.f32 %v1035_v60, %v979_v33  ;;  %v2927_v45 = vpop.permute.xlu1 %966 }
 0x17b   : > { %v734_v40 = vpop.f32.mrf.mxu0  ;;  %3601 = vst [vmem:[#allocation31_spill] sm:$0xff] %v2927_v45 }
 0x17c   : > { %v1124_v43 = vadd.f32 %v1035_v60, %v980_v49  ;;  %v735_v5 = vadd.f32 %v734_v40, %v2853_v21  ;;  %v2911_v10 = vpack.c.bf16 %v1123_v39, %v1121_v1  ;;  %v981_v28 = vmul.f32 %v2867_v44, %v837_v19 }
 0x17d   : > { %v736_v36 = vpop.f32.mrf.mxu0 }
 0x17e   : > { %3598 = vst [vmem:[#allocation28_spill] sm:$0xff] %v2911_v10  ;;  %v839_v55 = vmax.f32 %v735_v5, 0.0  ;;  %v2916_v38 = vpack.c.bf16 %v1124_v43, %v1122_v41  ;;  %v1125_v42 = vadd.f32 %v2871_v12, %v981_v28  ;;  %v2929_v33 = vpop.permute.xlu1 %1110  ;;  %v2940_v14 = vadd.f32 %v736_v36, %v2853_v21 }
 0x17f   : > { %v2914_v24 = vpop.f32.mrf.mxu0  ;;  %3602 = vst [vmem:[#allocation32_spill] sm:$0xff] %v2929_v33 }
 0x180   : > { %3599 = vst [vmem:[#allocation29_spill] sm:$0xff] %v2916_v38  ;;  %v983_v37 = vmul.f32 %v2897_v8, %v839_v55 }
 0x181   : > { %v742_v46 = vpop.f32.mrf.mxu0 }
 0x182   : > { %v1127_v60 = vadd.f32 %v2875_v22, %v983_v37  ;;  %v2931_v39 = vpop.permute.xlu1 %1114 }
 0x183   : > { %v744_v48 = vpop.f32.mrf.mxu0  ;;  %3603 = vst [vmem:[#allocation33_spill] sm:$0xff] %v2931_v39  ;;  %v2943_v39 = vadd.f32 %v742_v46, %v2851_v32 }
 0x184   : > { %v2921_v61 = vpack.c.bf16 %v1127_v60, %v1125_v42 }
 0x185   : > { %v746_v58 = vpop.f32.mrf.mxu0 }
 0x186   : > { %3600 = vst [vmem:[#allocation30_spill] sm:$0xff] %v2921_v61  ;;  %v2933_v41 = vpop.permute.xlu1 %549 }
 0x187   : > { %v2925_v0 = vpop.f32.mrf.mxu0  ;;  %3604 = vst [vmem:[#allocation34_spill] sm:$0xff] %v2933_v41 }
 0x189   : > { %v752_v62 = vpop.f32.mrf.mxu0 }
 0x18a   : > { %v2945_v10 = vpop.permute.xlu1 %958 }
 0x18b   : > { %v754_v35 = vpop.f32.mrf.mxu0  ;;  %3605 = vst [vmem:[#allocation35_spill] sm:$0xff] %v2945_v10 }
 0x18d   : > { %v756_v17 = vpop.f32.mrf.mxu0 }
 0x18f   : > { %v760_v26 = vpop.f32.mrf.mxu0 }
 0x191   : > { %v762_v30 = vpop.f32.mrf.mxu0 }
 0x193   : > { %v764_v49 = vpop.f32.mrf.mxu0 }
 0x195   : > { %v766_v19 = vpop.f32.mrf.mxu0 }
 0x197   : > { %v770_v1 = vpop.f32.mrf.mxu0 }
 0x198   : > { %v771_v21 = vadd.f32 %v770_v1, %v2732_v51 }
 0x199   : > { %v772_v40 = vpop.f32.mrf.mxu0 }
 0x19a   : > { %v773_v20 = vadd.f32 %v772_v40, %v2732_v51  ;;  %v2951_v40 = vadd.f32 %v744_v48, %v2832_v7  ;;  %v853_v1 = vmax.f32 %v771_v21, 0.0 }
 0x19b   : > { %v774_v43 = vpop.f32.mrf.mxu0 }
 0x19c   : > { %v775_v45 = vadd.f32 %v774_v43, %v2836_v9  ;;  %v854_v43 = vmax.f32 %v773_v20, 0.0  ;;  %v761_v20 = vadd.f32 %v760_v26, %v2841_v13  ;;  %v997_v21 = vmul.f32 %v2773_v56, %v853_v1 }
 0x19d   : > { %v776_v5 = vpop.f32.mrf.mxu0 }
 0x19e   : > { %v777_v55 = vadd.f32 %v776_v5, %v2836_v9  ;;  %v767_v5 = vadd.f32 %v766_v19, %v2764_v15  ;;  %v763_v9 = vadd.f32 %v762_v30, %v2841_v13  ;;  %v855_v48 = vmax.f32 %v775_v45, 0.0  ;;  %v2969_v30 = vpop.permute.xlu1 %1102 }
 0x19f   : > { %v780_v28 = vpop.f32.mrf.mxu0  ;;  %v753_v45 = vadd.f32 %v752_v62, %v2846_v18  ;;  %v751_v62 = vadd.f32 %v2925_v0, %v2846_v18 }
 0x1a0   : > { %v781_v42 = vadd.f32 %v780_v28, %v2829_v6  ;;  %v856_v38 = vmax.f32 %v777_v55, 0.0  ;;  %v852_v41 = vmax.f32 %v767_v5, 0.0 }
 0x1a1   : > { %v782_v37 = vpop.f32.mrf.mxu0 }
 0x1a2   : > { %v783_v60 = vadd.f32 %v782_v37, %v2829_v6  ;;  %v857_v36 = vmax.f32 %v781_v42, 0.0  ;;  %v2956_v37 = vadd.f32 %v746_v58, %v2832_v7  ;;  %v1000_v51 = vmul.f32 %v2879_v53, %v856_v38 }
 0x1a3   : > { %v784_v33 = vpop.f32.mrf.mxu0  ;;  %v850_v38 = vmax.f32 %v763_v9, 0.0 }
 0x1a4   : > { %v858_v61 = vmax.f32 %v783_v60, 0.0  ;;  %v785_v28 = vadd.f32 %v784_v33, %v2725_v47  ;;  %v757_v33 = vadd.f32 %v756_v17, %v2796_v27  ;;  %v765_v60 = vadd.f32 %v764_v49, %v2764_v15 }
 0x1a5   : > { %v786_v6 = vpop.f32.mrf.mxu0  ;;  %v1001_v17 = vmul.f32 %v2741_v52, %v857_v36  ;;  %v755_v49 = vadd.f32 %v754_v35, %v2796_v27  ;;  %v849_v35 = vmax.f32 %v761_v20, 0.0  ;;  %v846_v36 = vmax.f32 %v753_v45, 0.0 }
 0x1a6   : > { %v787_v46 = vadd.f32 %v786_v6, %v2725_v47  ;;  %v859_v19 = vmax.f32 %v785_v28, 0.0  ;;  %v1002_v47 = vmul.f32 %v2741_v52, %v858_v61  ;;  %v998_v61 = vmul.f32 %v2773_v56, %v854_v43 }
 0x1a7   : > { %v2959_v55 = vpop.f32.mrf.mxu0  ;;  %v851_v5 = vmax.f32 %v765_v60, 0.0  ;;  %v999_v28 = vmul.f32 %v2879_v53, %v855_v48  ;;  %v848_v6 = vmax.f32 %v757_v33, 0.0  ;;  %v996_v52 = vmul.f32 %v2881_v25, %v852_v41  ;;  %v2995_v33 = vpop.permute.xlu1 %1106 }
 0x1a8   : > { %v860_v10 = vmax.f32 %v787_v46, 0.0  ;;  %v1003_v7 = vmul.f32 %v2877_v50, %v859_v19  ;;  %v1145_v53 = vadd.f32 %v2748_v23, %v1001_v17  ;;  %v1142_v46 = vadd.f32 %v2780_v57, %v998_v61 }
 0x1a9   : > { %v2966_v58 = vpop.f32.mrf.mxu0  ;;  %v847_v43 = vmax.f32 %v755_v49, 0.0  ;;  %v995_v19 = vmul.f32 %v2881_v25, %v851_v5  ;;  %v1143_v18 = vadd.f32 %v2788_v59, %v999_v28  ;;  %v844_v56 = vmax.f32 %v2956_v37, 0.0 }
 0x1aa   : > { %v1004_v15 = vmul.f32 %v2877_v50, %v860_v10  ;;  %v1147_v13 = vadd.f32 %v2756_v54, %v1003_v7  ;;  %v1144_v50 = vadd.f32 %v2788_v59, %v1000_v51  ;;  %v1146_v10 = vadd.f32 %v2748_v23, %v1002_v47 }
 0x1ab   : > { %v2976_v42 = vpop.f32.mrf.mxu0  ;;  %v992_v23 = vmul.f32 %v2885_v16, %v848_v6  ;;  %v1140_v60 = vadd.f32 %v2822_v29, %v996_v52  ;;  %v741_v47 = vadd.f32 %v2914_v24, %v2851_v32  ;;  %v845_v25 = vmax.f32 %v751_v62, 0.0 }
 0x1ac   : > { %v1148_v26 = vadd.f32 %v2756_v54, %v1004_v15  ;;  %v994_v54 = vmul.f32 %v2805_v63, %v850_v38  ;;  %v1209_v0 = vpack.c.bf16 %v1147_v13, %v1145_v53  ;;  %v1208_v51 = vpack.c.bf16 %v1144_v50, %v1142_v46 }
 0x1ad   : > { %v2984_v27 = vpop.f32.mrf.mxu0  ;;  %v993_v7 = vmul.f32 %v2805_v63, %v849_v35  ;;  %v1141_v59 = vadd.f32 %v2780_v57, %v997_v21  ;;  %v733_v37 = vadd.f32 %v2906_v34, %v2855_v2  ;;  %v842_v20 = vmax.f32 %v2943_v39, 0.0  ;;  %v3606_v34 = vld [vmem:[#allocation17_spill] sm:$0xff] }
 0x1ae   : > { %v1210_v9 = vpack.c.bf16 %v1148_v26, %v1146_v10  ;;  %v990_v1 = vmul.f32 %v2838_v11, %v846_v36  ;;  %v1138_v17 = vadd.f32 %v2814_v4, %v994_v54  ;;  %v843_v32 = vmax.f32 %v2951_v40, 0.0  ;;  %v3024_v40 = vpop.permute.xlu1 %539  ;;  %v3608_v26 = vld [vmem:[#allocation16_spill] sm:$0xff]  ;;  %v1587_v54 = vld [vmem:[%s3518_s5 + $0x20] sm:$0xff] }
 0x1af   : > { %v2992_v41 = vpop.f32.mrf.mxu0  ;;  %v991_v63 = vmul.f32 %v2885_v16, %v847_v43  ;;  %v1139_v57 = vadd.f32 %v2822_v29, %v995_v19  ;;  %v1207_v24 = vpack.c.bf16 %v1143_v18, %v1141_v59  ;;  %v840_v45 = vmax.f32 %v2940_v14, 0.0  ;;  %v3607_v29 = vld [vmem:[#allocation18_spill] sm:$0xff]  ;;  %1871 = vperm.xlu1 %2264, %v1587_v54   ;;  %v971_v59 = vpop.permute.xlu0 %970 }
 0x1b0   : > { %1400 = vmatprep.subr.bf16.mxu0 %v1210_v9  ;;  %2168 = vmatprep.subr.bf16.mxu1 %v1210_v9  ;;  %v988_v2 = vmul.f32 %v2887_v3, %v844_v56  ;;  %v1136_v39 = vadd.f32 %v3606_v34, %v992_v23  ;;  %v1206_v38 = vpack.c.bf16 %v1140_v60, %v1138_v17  ;;  %v841_v61 = vmax.f32 %v741_v47, 0.0  ;;  %v1585_v47 = vld [vmem:[%s3518_s5 + $0x10] sm:$0xff] }
 0x1b1   : > { %v3001_v48 = vpop.f32.mrf.mxu0  ;;  %1401 = vmatpush1.bf16.msra.mxu0 %v1209_v0  ;;  %2180 = vmatpush1.bf16.msra.mxu1 %v1209_v0  ;;  %v989_v5 = vmul.f32 %v2838_v11, %v845_v25  ;;  %v1137_v28 = vadd.f32 %v2814_v4, %v993_v7  ;;  %v838_v16 = vmax.f32 %v733_v37, 0.0  ;;  %v986_v13 = vmul.f32 %v3607_v29, %v842_v20  ;;  %v3609_v4 = vld [vmem:[#allocation20_spill] sm:$0xff] }
 0x1b2   : > { %1402 = vmatprep.subr.bf16.mxu0 %v1208_v51  ;;  %2169 = vmatprep.subr.bf16.mxu1 %v1208_v51  ;;  %v1134_v14 = vadd.f32 %v3608_v26, %v990_v1  ;;  %v987_v52 = vmul.f32 %v2887_v3, %v843_v32  ;;  %v1135_v50 = vadd.f32 %v3606_v34, %v991_v63  ;;  %v1588_v3 = vld [vmem:[%s3518_s5 + $0x28] sm:$0xff]  ;;  %v3043_v0 = vpop.permute.xlu1 %950  ;;  %v3611_v32 = vld [vmem:[#allocation21_spill] sm:$0xff] }
 0x1b3   : > { %v3012_v15 = vpop.f32.mrf.mxu0  ;;  %v1205_v10 = vpack.c.bf16 %v1139_v57, %v1137_v28  ;;  %v984_v11 = vmul.f32 %v2897_v8, %v840_v45  ;;  %v1132_v62 = vadd.f32 %v3609_v4, %v988_v2  ;;  %v985_v53 = vmul.f32 %v3607_v29, %v841_v61  ;;  %v3610_v8 = vld [vmem:[#allocation19_spill] sm:$0xff]  ;;  %1876 = vperm.xlu0 %2265, %v1588_v3   ;;  %v963_v29 = vpop.permute.xlu0 %962 }
 0x1b4   : > { %v1204_v21 = vpack.c.bf16 %v1136_v39, %v1134_v14  ;;  %v1133_v36 = vadd.f32 %v3608_v26, %v989_v5  ;;  %v982_v46 = vmul.f32 %v2867_v44, %v838_v16  ;;  %v1130_v9 = vadd.f32 %v3610_v8, %v986_v13  ;;  %v1586_v44 = vld [vmem:[%s3518_s5 + $0x18] sm:$0xff]  ;;  %v3614_v5 = vld [vmem:[#allocation25_spill] sm:$0xff] }
 0x1b5   : > { %v3020_v49 = vpop.f32.mrf.mxu0  ;;  %1403 = vmatpush1.bf16.msra.mxu0 %v1207_v24  ;;  %2181 = vmatpush1.bf16.msra.mxu1 %v1207_v24  ;;  %v1131_v19 = vadd.f32 %v3609_v4, %v987_v52  ;;  %v1128_v56 = vadd.f32 %v2875_v22, %v984_v11  ;;  %v1129_v51 = vadd.f32 %v3610_v8, %v985_v53  ;;  %v3613_v39 = vld [vmem:[#allocation34_spill] sm:$0xff]  ;;  %v3617_v4 = vld [vmem:[#allocation29_spill] sm:$0xff]  ;;  %v3619_v53 = vld [vmem:[#allocation31_spill] sm:$0xff] }
 0x1b6   : > { %1404 = vmatprep.subr.bf16.mxu0 %v1206_v38  ;;  %2170 = vmatprep.subr.bf16.mxu1 %v1206_v38  ;;  %v1203_v18 = vpack.c.bf16 %v1135_v50, %v1133_v36  ;;  %v1202_v60 = vpack.c.bf16 %v1132_v62, %v1130_v9  ;;  %v1126_v25 = vadd.f32 %v2871_v12, %v982_v46  ;;  %v3055_v17 = vpop.permute.xlu1 %1094  ;;  %v3612_v12 = vld [vmem:[#allocation22_spill] sm:$0xff]  ;;  %v3616_v50 = vld [vmem:[#allocation23_spill] sm:$0xff] }
 0x1b7   : > { %v810_v6 = vpop.f32.mrf.mxu0  ;;  %v1201_v22 = vpack.c.bf16 %v1131_v19, %v1129_v51  ;;  %1736 = vperm.xlu1 %2264, %v1586_v44   ;;  %1731 = vperm.xlu0 %2265, %v1585_v47   ;;  %v807_v38 = vadd.f32 %v3020_v49, %v3613_v39  ;;  %v3615_v52 = vld [vmem:[#allocation30_spill] sm:$0xff]  ;;  %v801_v8 = vadd.f32 %v2992_v41, %v3616_v50  ;;  %v955_v51 = vpop.permute.xlu0 %954  ;;  %v3623_v41 = vld [vmem:[#allocation32_spill] sm:$0xff] }
 0x1b8   : > { %v1200_v1 = vpack.c.bf16 %v1128_v56, %v1126_v25  ;;  %v811_v13 = vadd.f32 %v810_v6, %v3612_v12 }
 0x1b9   : > { %v812_v35 = vpop.f32.mrf.mxu0  ;;  %1405 = vmatpush1.bf16.msra.mxu0 %v1205_v10  ;;  %2182 = vmatpush1.bf16.msra.mxu1 %v1205_v10  ;;  %v805_v10 = vadd.f32 %v3012_v15, %v3613_v39  ;;  %v868_v15 = vmax.f32 %v807_v38, 0.0 }
 0x1ba   : > { %1406 = vmatprep.subr.bf16.mxu0 %v1204_v21  ;;  %2171 = vmatprep.subr.bf16.mxu1 %v1204_v21  ;;  %v813_v24 = vadd.f32 %v812_v35, %v3612_v12  ;;  %v1099_v62 = vpop.permute.xlu1 %1098  ;;  %v3618_v35 = vld [vmem:[#allocation24_spill] sm:$0xff]  ;;  %v869_v9 = vmax.f32 %v811_v13, 0.0  ;;  %v3625_v12 = vld [vmem:[#allocation26_spill] sm:$0xff] }
 0x1bb   : > { %v814_v43 = vpop.f32.mrf.mxu0  ;;  %v793_v6 = vadd.f32 %v2966_v58, %v3618_v35  ;;  %v3620_v58 = vld [vmem:[#allocation28_spill] sm:$0xff]  ;;  %v943_v13 = vpop.permute.xlu0 %942 }
 0x1bc   : > { %v815_v2 = vadd.f32 %v814_v43, %v2923_v31  ;;  %v870_v11 = vmax.f32 %v813_v24, 0.0 }
 0x1bd   : > { %v816_v23 = vpop.f32.mrf.mxu0  ;;  %1407 = vmatpush1.bf16.msra.mxu0 %v1203_v18  ;;  %2183 = vmatpush1.bf16.msra.mxu1 %v1203_v18  ;;  %v795_v18 = vadd.f32 %v2976_v42, %v3024_v40  ;;  %v791_v42 = vadd.f32 %v2959_v55, %v3618_v35 }
 0x1be   : > { %1408 = vmatprep.subr.bf16.mxu0 %v1202_v60  ;;  %2172 = vmatprep.subr.bf16.mxu1 %v1202_v60  ;;  %v817_v37 = vadd.f32 %v816_v23, %v2923_v31  ;;  %v803_v31 = vadd.f32 %v3001_v48, %v3616_v50  ;;  %v871_v21 = vmax.f32 %v815_v2, 0.0  ;;  %v797_v48 = vadd.f32 %v2984_v27, %v3024_v40  ;;  %v3621_v60 = vld [vmem:[#allocation35_spill] sm:$0xff] }
 0x1bf   : > { %v820_v7 = vpop.f32.mrf.mxu0  ;;  %v867_v23 = vmax.f32 %v805_v10, 0.0  ;;  %v1014_v44 = vmul.f32 %v3621_v60, %v870_v11  ;;  %v3622_v27 = vld [vmem:[#allocation27_spill] sm:$0xff]  ;;  %v863_v55 = vmax.f32 %v795_v18, 0.0 }
 0x1c0   : > { %v821_v63 = vadd.f32 %v820_v7, %v3611_v32  ;;  %v872_v61 = vmax.f32 %v817_v37, 0.0  ;;  %v866_v56 = vmax.f32 %v803_v31, 0.0  ;;  %v1015_v47 = vmul.f32 %v963_v29, %v871_v21  ;;  %v3624_v7 = vld [vmem:[#allocation33_spill] sm:$0xff]  ;;  %v2300_v18 = vld [vmem:[%s3515_s2 + $0x64] ss:$8 sps:$4 sm:$0xff]  }
 0x1c1   : > { %v822_v20 = vpop.f32.mrf.mxu0  ;;  %1409 = vmatpush1.bf16.msra.mxu0 %v1201_v22  ;;  %2184 = vmatpush1.bf16.msra.mxu1 %v1201_v22  ;;  %v864_v40 = vmax.f32 %v797_v48, 0.0  ;;  %v1012_v37 = vmul.f32 %v955_v51, %v868_v15  ;;  %v1011_v39 = vmul.f32 %v955_v51, %v867_v23  ;;  %v2282_v48 = vld [vmem:[%s3515_s2] ss:$8 sps:$4 sm:$0xff]   ;;  %v2291_v15 = vld [vmem:[%s3515_s2 + $0x14] ss:$8 sps:$4 sm:$0xff]  }
 0x1c2   : > { %v823_v57 = vadd.f32 %v822_v20, %v3611_v32  ;;  %1410 = vmatprep.subr.bf16.mxu0 %v1200_v1  ;;  %2173 = vmatprep.subr.bf16.mxu1 %v1200_v1  ;;  %v873_v26 = vmax.f32 %v821_v63, 0.0  ;;  %v1016_v3 = vmul.f32 %v963_v29, %v872_v61  ;;  %v947_v1 = vpop.permute.xlu1 %946  ;;  %v865_v32 = vmax.f32 %v801_v8, 0.0  ;;  %v2290_v8 = vld [vmem:[%s3515_s2 + $0x40] ss:$8 sps:$4 sm:$0xff]  }
 0x1c3   : > { %v824_v45 = vpop.f32.mrf.mxu0  ;;  %v1013_v63 = vmul.f32 %v3621_v60, %v869_v9  ;;  %v1010_v2 = vmul.f32 %v3043_v0, %v866_v56  ;;  %v1159_v38 = vadd.f32 %v2995_v33, %v1015_v47  ;;  %v861_v29 = vmax.f32 %v791_v42, 0.0  ;;  %v2297_v9 = vld [vmem:[%s3515_s2 + $0x24] ss:$8 sps:$4 sm:$0xff]   ;;  %v2302_v23 = vld [vmem:[%s3515_s2 + $0x60] ss:$8 sps:$4 sm:$0xff]  }
 0x1c4   : > { %v874_v34 = vmax.f32 %v823_v57, 0.0  ;;  %v825_v28 = vadd.f32 %v824_v45, %v3614_v5  ;;  %v1017_v43 = vmul.f32 %v3619_v53, %v873_v26  ;;  %v1160_v20 = vadd.f32 %v2995_v33, %v1016_v3  ;;  %v2288_v3 = vld [vmem:[%s3515_s2 + $0x44] ss:$8 sps:$4 sm:$0xff]   ;;  %v2303_v60 = vld [vmem:[%s3515_s2 + $0x74] ss:$8 sps:$4 sm:$0xff]  }
 0x1c5   : > { %v826_v16 = vpop.f32.mrf.mxu0  ;;  %1411 = vmatpush1.bf16.msra.mxu0 %v3615_v52  ;;  %2185 = vmatpush1.bf16.msra.mxu1 %v3615_v52  ;;  %v862_v45 = vmax.f32 %v793_v6, 0.0  ;;  %v1009_v26 = vmul.f32 %v3043_v0, %v865_v32  ;;  %v1154_v50 = vadd.f32 %v3055_v17, %v1010_v2  ;;  %v1007_v31 = vmul.f32 %v947_v1, %v863_v55  ;;  %v1087_v6 = vpop.permute.xlu0 %1086  ;;  %v2308_v51 = vld [vmem:[%s3515_s2 + $0x80] ss:$8 sps:$4 sm:$0xff]   ;;  %v2309_v47 = vld [vmem:[%s3515_s2 + $0x94] ss:$8 sps:$4 sm:$0xff]  }
 0x1c6   : > { %v827_v14 = vadd.f32 %v826_v16, %v3614_v5  ;;  %v875_v49 = vmax.f32 %v825_v28, 0.0  ;;  %1412 = vmatprep.subr.bf16.mxu0 %v3617_v4  ;;  %v1018_v36 = vmul.f32 %v3619_v53, %v874_v34  ;;  %2174 = vmatprep.subr.bf16.mxu1 %v3617_v4  ;;  %v1161_v57 = vadd.f32 %v3623_v41, %v1017_v43  ;;  %v1091_v33 = vpop.permute.xlu1 %1090  ;;  %v2294_v43 = vld [vmem:[%s3515_s2 + $0x54] ss:$8 sps:$4 sm:$0xff]   ;;  %v2318_v42 = vld [vmem:[%s3515_s2 + $0xc4] ss:$8 sps:$4 sm:$0xff]  }
 0x1c7   : > { %v1158_v34 = vadd.f32 %v2969_v30, %v1014_v44  ;;  %v1008_v5 = vmul.f32 %v947_v1, %v864_v40  ;;  %v1156_v28 = vadd.f32 %v1099_v62, %v1012_v37  ;;  %v1006_v52 = vmul.f32 %v943_v13, %v862_v45  ;;  %v2305_v44 = vld [vmem:[%s3515_s2 + $0x70] ss:$8 sps:$4 sm:$0xff]   ;;  %v2320_v40 = vld [vmem:[%s3515_s2 + $0xc0] ss:$8 sps:$4 sm:$0xff]   ;;  %v2321_v37 = vld [vmem:[%s3515_s2 + $0xd4] ss:$8 sps:$4 sm:$0xff]  }
 0x1c8   : > { %v876_v54 = vmax.f32 %v827_v14, 0.0  ;;  %v1019_v46 = vmul.f32 %v971_v59, %v875_v49  ;;  %v1162_v25 = vadd.f32 %v3623_v41, %v1018_v36  ;;  %v1157_v14 = vadd.f32 %v2969_v30, %v1013_v63  ;;  %v2311_v41 = vld [vmem:[%s3515_s2 + $0x90] ss:$8 sps:$4 sm:$0xff]   ;;  %v2324_v1 = vld [vmem:[%s3515_s2 + $0xe4] ss:$8 sps:$4 sm:$0xff]  }
 0x1c9   : > { %1413 = vmatpush1.bf16.msra.mxu0 %v3620_v58  ;;  %2186 = vmatpush1.bf16.msra.mxu1 %v3620_v58  ;;  %v1216_v16 = vpack.c.bf16 %v1160_v20, %v1158_v34  ;;  %v1155_v10 = vadd.f32 %v1099_v62, %v1011_v39  ;;  %v1152_v49 = vadd.f32 %v1091_v33, %v1008_v5  ;;  %v2296_v58 = vld [vmem:[%s3515_s2 + $0x50] ss:$8 sps:$4 sm:$0xff]   ;;  %v3626_v56 = vmov 0   ;;  %v2326_v32 = vld [vmem:[%s3515_s2 + $0xe0] ss:$8 sps:$4 sm:$0xff]  }
 0x1ca   : > { %v1020_v19 = vmul.f32 %v971_v59, %v876_v54  ;;  %1414 = vmatprep.subr.bf16.mxu0 %v3622_v27  ;;  %v1163_v22 = vadd.f32 %v3624_v7, %v1019_v46  ;;  %2175 = vmatprep.subr.bf16.mxu1 %v3622_v27  ;;  %v1215_v11 = vpack.c.bf16 %v1159_v38, %v1157_v14  ;;  %v2293_v46 = vld [vmem:[%s3515_s2 + $0x10] ss:$8 sps:$4 sm:$0xff]   ;;  %v2306_v27 = vld [vmem:[%s3515_s2 + $0x84] ss:$8 sps:$4 sm:$0xff]  }
 0x1cb   : > { %v1214_v4 = vpack.c.bf16 %v1156_v28, %v1154_v50  ;;  %v1005_v35 = vmul.f32 %v943_v13, %v861_v29  ;;  %v1153_v21 = vadd.f32 %v3055_v17, %v1009_v26  ;;  %v1150_v0 = vadd.f32 %v1087_v6, %v1006_v52  ;;  %v2285_v17 = vld [vmem:[%s3515_s2 + $0x30] ss:$8 sps:$4 sm:$0xff]  }
 0x1cc   : > { %v1164_v59 = vadd.f32 %v3624_v7, %v1020_v19  ;;  %v1217_v61 = vpack.c.bf16 %v1163_v22, %v1161_v57  ;;  %v1151_v30 = vadd.f32 %v1091_v33, %v1007_v31  ;;  %v2299_v19 = vld [vmem:[%s3515_s2 + $0x20] ss:$8 sps:$4 sm:$0xff]   ;;  %v2315_v22 = vld [vmem:[%s3515_s2 + $0xb4] ss:$8 sps:$4 sm:$0xff]   ;;  %v2323_v20 = vld [vmem:[%s3515_s2 + $0xd0] ss:$8 sps:$4 sm:$0xff]  }
 0x1cd   : > { %1415 = vmatpush1.bf16.msra.mxu0 %v3625_v12  ;;  %2187 = vmatpush1.bf16.msra.mxu1 %v3625_v12  ;;  %v1213_v53 = vpack.c.bf16 %v1155_v10, %v1153_v21  ;;  %v1212_v36 = vpack.c.bf16 %v1152_v49, %v1150_v0  ;;  %v1149_v54 = vadd.f32 %v1087_v6, %v1005_v35  ;;  %v2314_v7 = vld [vmem:[%s3515_s2 + $0xa0] ss:$8 sps:$4 sm:$0xff]  }
 0x1ce   : > { %v1218_v24 = vpack.c.bf16 %v1164_v59, %v1162_v25  ;;  %v2312_v25 = vld [vmem:[%s3515_s2 + $0xa4] ss:$8 sps:$4 sm:$0xff]   ;;  %v2317_v59 = vld [vmem:[%s3515_s2 + $0xb0] ss:$8 sps:$4 sm:$0xff]  }
 0x1cf   : > { %v1211_v62 = vpack.c.bf16 %v1151_v30, %v1149_v54 }
 0x1d0   : > { %1424 = vmatprep.subr.bf16.mxu0 %v1218_v24  ;;  %2176 = vmatprep.subr.bf16.mxu1 %v1218_v24 }
 0x1d1   : > { %1425 = vmatpush2.bf16.msra.mxu0 %v1217_v61  ;;  %2188 = vmatpush2.bf16.msra.mxu1 %v1217_v61 }
 0x1d2   : > { %1426 = vmatprep.subr.bf16.mxu0 %v1216_v16  ;;  %2177 = vmatprep.subr.bf16.mxu1 %v1216_v16 }
 0x1d5   : > { %1427 = vmatpush2.bf16.msra.mxu0 %v1215_v11  ;;  %2189 = vmatpush2.bf16.msra.mxu1 %v1215_v11 }
 0x1d6   : > { %1428 = vmatprep.subr.bf16.mxu0 %v1214_v4  ;;  %2178 = vmatprep.subr.bf16.mxu1 %v1214_v4 }
 0x1d9   : > { %1429 = vmatpush2.bf16.msra.mxu0 %v1213_v53  ;;  %2190 = vmatpush2.bf16.msra.mxu1 %v1213_v53 }
 0x1da   : > { %1430 = vmatprep.subr.bf16.mxu0 %v1212_v36  ;;  %2179 = vmatprep.subr.bf16.mxu1 %v1212_v36 }
 0x1dd   : > { %1431 = vmatpush2.bf16.msra.mxu0 %v1211_v62  ;;  %2191 = vmatpush2.bf16.msra.mxu1 %v1211_v62 }
 0x1e0   : > { %1433 = vmatmul.mubr.bf16.vlgmr.msra.gmra.mxu0 %v2282_v48  ;;  %1463 = vmatmul.mubr.bf16.vlgmr.msra.gmra.mxu1 %v2285_v17 }
 0x1e1   : > { %2146 = vmatprep.mubr.msk.bf16.mxu0 %vm1354_vm6, %v2291_v15  ;;  %2149 = vmatprep.mubr.msk.bf16.mxu1 %vm1354_vm6, %v2288_v3 }
 0x1e8   : > { %1443 = vmatmul.mubr.bf16.gmra.mxu0 %v2293_v46  ;;  %1473 = vmatmul.mubr.bf16.gmra.mxu1 %v2290_v8 }
 0x1e9   : > { %2147 = vmatprep.mubr.msk.bf16.mxu0 %vm1354_vm6, %v2297_v9  ;;  %2150 = vmatprep.mubr.msk.bf16.mxu1 %vm1354_vm6, %v2294_v43 }
 0x1f0   : > { %1453 = vmatmul.mubr.bf16.gmra.mxu0 %v2299_v19  ;;  %1483 = vmatmul.mubr.bf16.gmra.mxu1 %v2296_v58 }
 0x1f1   : > { %1944 = vmatprep.mubr.bf16.mxu0 %v3626_v56  ;;  %2151 = vmatprep.mubr.msk.bf16.mxu1 %vm1354_vm6, %v2300_v18 }
 0x1f8   : > { %1493 = vmatmul.mubr.bf16.gmra.mxu1 %v2302_v23 }
 0x1f9   : > { %2152 = vmatprep.mubr.msk.bf16.mxu1 %vm1354_vm6, %v2303_v60 }
 0x200   : > { %1503 = vmatmul.mubr.bf16.gmra.mxu1 %v2305_v44 }
 0x201   : > { %2153 = vmatprep.mubr.msk.bf16.mxu1 %vm1354_vm6, %v2306_v27 }
 0x208   : > { %1513 = vmatmul.mubr.bf16.gmra.mxu1 %v2308_v51 }
 0x209   : > { %2154 = vmatprep.mubr.msk.bf16.mxu1 %vm1354_vm6, %v2309_v47 }
 0x210   : > { %1523 = vmatmul.mubr.bf16.gmra.mxu1 %v2311_v41 }
 0x211   : > { %2155 = vmatprep.mubr.msk.bf16.mxu1 %vm1354_vm6, %v2312_v25 }
 0x218   : > { %1533 = vmatmul.mubr.bf16.gmra.mxu1 %v2314_v7 }
 0x219   : > { %2156 = vmatprep.mubr.msk.bf16.mxu1 %vm1354_vm6, %v2315_v22 }
 0x220   : > { %1543 = vmatmul.mubr.bf16.gmra.mxu1 %v2317_v59 }
 0x221   : > { %2157 = vmatprep.mubr.msk.bf16.mxu1 %vm1354_vm6, %v2318_v42 }
 0x228   : > { %1553 = vmatmul.mubr.bf16.gmra.mxu1 %v2320_v40 }
 0x229   : > { %2158 = vmatprep.mubr.msk.bf16.mxu1 %vm1354_vm6, %v2321_v37  ;;  %v1584_v37 = vld [vmem:[%s3518_s5 + $0x8] sm:$0xff] }
 0x230   : > { %1563 = vmatmul.mubr.bf16.gmra.mxu1 %v2323_v20  ;;  %v1583_v20 = vld [vmem:[%s3518_s5] sm:$0xff] }
 0x231   : > { %2159 = vmatprep.mubr.msk.bf16.mxu1 %vm1354_vm6, %v2324_v1  ;;  %v1892_v1 = vld [vmem:[%s3519_s6 + $0x8] sm:$0xff] }
 0x238   : > { %1573 = vmatmul.mubr.bf16.gmra.mxu1 %v2326_v32  ;;  %v3288_v32 = vpop.permute.xlu0 %1876 }
 0x2a0   : > { %v1434_v63 = vpop.f32.mrf.mxu0  ;;  %v1464_v57 = vpop.f32.mrf.mxu1 }
 0x2a1   : > { %1589 = vrot.lane.b32.xlu0 %v1434_v63, %s2356_s18  ;;  %1649 = vrot.lane.b32.xlu1 %v1464_v57, %s2358_s22  ;;  %v3290_v63 = vpop.permute.xlu1 %1871  ;;  %v1891_v57 = vld [vmem:[%s3519_s6] sm:$0xff] }
 0x2a2   : > { %v1436_v12 = vpop.f32.mrf.mxu0  ;;  %v1466_v24 = vpop.f32.mrf.mxu1 }
 0x2a4   : > { %v1438_v45 = vpop.f32.mrf.mxu0  ;;  %v1468_v2 = vpop.f32.mrf.mxu1 }
 0x2a5   : > { %1593 = vrot.lane.b32.xlu0 %v1436_v12, %s2356_s18  ;;  %1653 = vrot.lane.b32.xlu1 %v1466_v24, %s2358_s22  ;;  %v3295_v12 = vpop.permute.xlu0 %1731  ;;  %v3297_v24 = vpop.permute.xlu1 %1736 }
 0x2a6   : > { %v1440_v34 = vpop.f32.mrf.mxu0  ;;  %v1470_v55 = vpop.f32.mrf.mxu1 }
 0x2a8   : > { %v3208_v39 = vpop.f32.mrf.mxu0  ;;  %v1474_v38 = vpop.f32.mrf.mxu1 }
 0x2a9   : > { %1651 = vrot.lane.b32.xlu0 %v1468_v2, %s2358_s22  ;;  %1591 = vrot.lane.b32.xlu1 %v1438_v45, %s2356_s18  ;;  %v3627_v45 = vmov 1  }
 0x2aa   : > { %v3212_v61 = vpop.f32.mrf.mxu0  ;;  %v1476_v5 = vpop.f32.mrf.mxu1 }
 0x2ac   : > { %v3214_v28 = vpop.f32.mrf.mxu0  ;;  %v1478_v16 = vpop.f32.mrf.mxu1 }
 0x2ad   : > { %1655 = vrot.lane.b32.xlu0 %v1470_v55, %s2358_s22  ;;  %1595 = vrot.lane.b32.xlu1 %v1440_v34, %s2356_s18  ;;  %v3628_v34 = vmov 2  }
 0x2ae   : > { %v3218_v29 = vpop.f32.mrf.mxu0  ;;  %v1480_v13 = vpop.f32.mrf.mxu1 }
 0x2b0   : > { %v3220_v26 = vpop.f32.mrf.mxu1  ;;  %v1454_v14 = vpop.f32.mrf.mxu0 }
 0x2b1   : > { %1667 = vrot.lane.b32.xlu0 %v1478_v16, %s2356_s18  ;;  %1665 = vrot.lane.b32.xlu1 %v1474_v38, %s2356_s18 }
 0x2b2   : > { %v3224_v52 = vpop.f32.mrf.mxu1  ;;  %v3229_v31 = vpop.f32.mrf.mxu0 }
 0x2b4   : > { %v3226_v50 = vpop.f32.mrf.mxu1  ;;  %v1458_v10 = vpop.f32.mrf.mxu0 }
 0x2b5   : > { %1671 = vrot.lane.b32.xlu0 %v1480_v13, %s2356_s18  ;;  %1669 = vrot.lane.b32.xlu1 %v1476_v5, %s2356_s18 }
 0x2b6   : > { %v3232_v33 = vpop.f32.mrf.mxu1  ;;  %v1460_v42 = vpop.f32.mrf.mxu0 }
 0x2b8   : > { %v1494_v11 = vpop.f32.mrf.mxu1 }
 0x2b9   : > { %1609 = vrot.lane.b32.xlu0 %v1454_v14, %s2353_s15  ;;  %1611 = vrot.lane.b32.xlu1 %v1458_v10, %s2353_s15 }
 0x2ba   : > { %v1496_v49 = vpop.f32.mrf.mxu1 }
 0x2bc   : > { %v1498_v4 = vpop.f32.mrf.mxu1 }
 0x2bd   : > { %1693 = vrot.lane.b32.xlu0 %v1496_v49, %s2353_s15  ;;  %1689 = vrot.lane.b32.xlu1 %v1494_v11, %s2353_s15 }
 0x2be   : > { %v1500_v35 = vpop.f32.mrf.mxu1 }
 0x2c0   : > { %v1504_v6 = vpop.f32.mrf.mxu1 }
 0x2c1   : > { %1709 = vrot.lane.b32.xlu0 %v1504_v6, %s2355_s17  ;;  %1691 = vrot.lane.b32.xlu1 %v1498_v4, %s2353_s15 }
 0x2c2   : > { %v1506_v21 = vpop.f32.mrf.mxu1 }
 0x2c4   : > { %v1508_v0 = vpop.f32.mrf.mxu1 }
 0x2c5   : > { %1713 = vrot.lane.b32.xlu0 %v1506_v21, %s2355_s17  ;;  %1695 = vrot.lane.b32.xlu1 %v1500_v35, %s2353_s15 }
 0x2c6   : > { %v1510_v30 = vpop.f32.mrf.mxu1 }
 0x2c8   : > { %v1514_v53 = vpop.f32.mrf.mxu1 }
 0x2c9   : > { %1711 = vrot.lane.b32.xlu1 %v1508_v0, %s2355_s17 }
 0x2ca   : > { %v1516_v36 = vpop.f32.mrf.mxu1 }
 0x2cc   : > { %v1518_v54 = vpop.f32.mrf.mxu1 }
 0x2cd   : > { %1751 = vrot.lane.b32.xlu0 %v1518_v54, %s2357_s19  ;;  %1715 = vrot.lane.b32.xlu1 %v1510_v30, %s2355_s17 }
 0x2ce   : > { %v1520_v62 = vpop.f32.mrf.mxu1 }
 0x2d0   : > { %v1524_v48 = vpop.f32.mrf.mxu1 }
 0x2d1   : > { %1755 = vrot.lane.b32.xlu0 %v1520_v62, %s2357_s19  ;;  %1749 = vrot.lane.b32.xlu1 %v1514_v53, %s2357_s19  ;;  %v3630_v62 = vld [vmem:[#allocation14_spill] sm:$0xff] }
 0x2d2   : > { %v1526_v17 = vpop.f32.mrf.mxu1 }
 0x2d4   : > { %v1528_v15 = vpop.f32.mrf.mxu1 }
 0x2d5   : > { %1767 = vrot.lane.b32.xlu0 %v1528_v15, %s2358_s22  ;;  %1753 = vrot.lane.b32.xlu1 %v1516_v36, %s2357_s19 }
 0x2d6   : > { %v1530_v3 = vpop.f32.mrf.mxu1 }
 0x2d8   : > { %v1534_v46 = vpop.f32.mrf.mxu1 }
 0x2d9   : > { %1771 = vrot.lane.b32.xlu0 %v1530_v3, %s2358_s22  ;;  %1765 = vrot.lane.b32.xlu1 %v1524_v48, %s2358_s22 }
 0x2da   : > { %v1536_v8 = vpop.f32.mrf.mxu1 }
 0x2dc   : > { %v1538_v9 = vpop.f32.mrf.mxu1 }
 0x2dd   : > { %1787 = vrot.lane.b32.xlu0 %v1538_v9, %s2356_s18  ;;  %1769 = vrot.lane.b32.xlu1 %v1526_v17, %s2358_s22  ;;  %v3631_v17 = vld [vmem:[#allocation15_spill] sm:$0xff] }
 0x2de   : > { %v1540_v43 = vpop.f32.mrf.mxu1 }
 0x2e0   : > { %v3253_v19 = vpop.f32.mrf.mxu1 }
 0x2e1   : > { %1791 = vrot.lane.b32.xlu0 %v1540_v43, %s2356_s18  ;;  %1785 = vrot.lane.b32.xlu1 %v1534_v46, %s2356_s18 }
 0x2e2   : > { %v3257_v58 = vpop.f32.mrf.mxu1 }
 0x2e4   : > { %v3259_v18 = vpop.f32.mrf.mxu1 }
 0x2e5   : > { %1789 = vrot.lane.b32.xlu1 %v1536_v8, %s2356_s18 }
 0x2e6   : > { %v3262_v56 = vpop.f32.mrf.mxu1 }
 0x2e8   : > { %v1554_v23 = vpop.f32.mrf.mxu1 }
 0x2e9   : > { %1809 = vrot.lane.b32.xlu1 %v1554_v23, %s2353_s15  ;;  %v3632_v23 = vld [vmem:[#allocation10_spill] sm:$0xff] }
 0x2ea   : > { %v1556_v60 = vpop.f32.mrf.mxu1 }
 0x2ec   : > { %v1558_v44 = vpop.f32.mrf.mxu1 }
 0x2ed   : > { %1811 = vrot.lane.b32.xlu0 %v1558_v44, %s2353_s15  ;;  %1813 = vrot.lane.b32.xlu1 %v1556_v60, %s2353_s15  ;;  %v3633_v44 = vld [vmem:[#allocation11_spill] sm:$0xff] }
 0x2ee   : > { %v1560_v27 = vpop.f32.mrf.mxu1 }
 0x2f0   : > { %v1564_v51 = vpop.f32.mrf.mxu1 }
 0x2f1   : > { %1815 = vrot.lane.b32.xlu0 %v1560_v27, %s2353_s15  ;;  %1829 = vrot.lane.b32.xlu1 %v1564_v51, %s2355_s17 }
 0x2f2   : > { %v1566_v47 = vpop.f32.mrf.mxu1 }
 0x2f4   : > { %v1568_v41 = vpop.f32.mrf.mxu1 }
 0x2f5   : > { %1831 = vrot.lane.b32.xlu0 %v1568_v41, %s2355_s17  ;;  %1833 = vrot.lane.b32.xlu1 %v1566_v47, %s2355_s17 }
 0x2f6   : > { %v1570_v25 = vpop.f32.mrf.mxu1 }
 0x2f8   : > { %v1574_v7 = vpop.f32.mrf.mxu1 }
 0x2f9   : > { %1835 = vrot.lane.b32.xlu0 %v1570_v25, %s2355_s17  ;;  %1849 = vrot.lane.b32.xlu1 %v1574_v7, %s2354_s16 }
 0x2fa   : > { %v1576_v22 = vpop.f32.mrf.mxu1 }
 0x2fc   : > { %v1578_v59 = vpop.f32.mrf.mxu1 }
 0x2fd   : > { %1851 = vrot.lane.b32.xlu0 %v1578_v59, %s2354_s16  ;;  %1853 = vrot.lane.b32.xlu1 %v1576_v22, %s2354_s16 }
 0x2fe   : > { %v1580_v40 = vpop.f32.mrf.mxu1 }
 0x301   : > { %1855 = vrot.lane.b32.xlu0 %v1580_v40, %s2354_s16  ;;  %1615 = vrot.lane.b32.xlu1 %v1460_v42, %s2353_s15 }
 0x305   : > { %1613 = vrot.lane.b32.xlu0 %v3229_v31, %s2353_s15  ;;  %1636 = vperm.xlu1 %2264, %v1584_v37  }
 0x309   : > { %1631 = vperm.xlu0 %2265, %v1583_v20   ;;  %1900 = vperm.xlu1 %2264, %v1892_v1  }
 0x30d   : > { %1895 = vperm.xlu0 %2265, %v1891_v57   ;;  %2267 = vset.pattern.permute.xlu1 %v3627_v45 }
 0x30e   : > { %1964 = vperm.xlu1 %2267, %v1892_v1  }
 0x311   : > { %2266 = vset.pattern.permute.xlu0 %v3627_v45 }
 0x312   : > { %1960 = vperm.xlu0 %2266, %v1891_v57   ;;  %2268 = vset.pattern.permute.xlu1 %v3628_v34 }
 0x313   : > { %v1590_v2 = vpop.permute.xlu0 %1589  ;;  %v1650_v55 = vpop.permute.xlu1 %1649  ;;  %1972 = vperm.xlu1 %2268, %v1891_v57  }
 0x316   : > { %2269 = vset.pattern.permute.xlu0 %v3628_v34 }
 0x317   : > { %v1594_v38 = vpop.permute.xlu0 %1593  ;;  %v1654_v5 = vpop.permute.xlu1 %1653  ;;  %1976 = vperm.xlu0 %2269, %v1892_v1  }
 0x318   : > { %v3305_v13 = vsel %vm364_vm12, %v1590_v2, %v1594_v38  ;;  %v3309_v14 = vsel %vm364_vm12, %v1594_v38, %v1590_v2  ;;  %v1657_v31 = vsel %vm355_vm3, %v1650_v55, %v1654_v5  ;;  %v1659_v10 = vsel %vm355_vm3, %v1654_v5, %v1650_v55  ;;  %v3634_v55 = vld [vmem:[#allocation6_spill] sm:$0xff]  ;;  %v3635_v5 = vld [vmem:[#allocation7_spill] sm:$0xff] }
 0x319   : > { %v1661_v51 = vmul.f32 %v3630_v62, %v1659_v10  ;;  %v1662_v47 = vmul.f32 %v3631_v17, %v1657_v31 }
 0x31b   : > { %v1652_v11 = vpop.permute.xlu0 %1651  ;;  %v1592_v49 = vpop.permute.xlu1 %1591 }
 0x31f   : > { %v1656_v4 = vpop.permute.xlu0 %1655  ;;  %v1596_v35 = vpop.permute.xlu1 %1595 }
 0x320   : > { %v1658_v6 = vsel %vm355_vm3, %v1652_v11, %v1656_v4  ;;  %v1660_v21 = vsel %vm355_vm3, %v1656_v4, %v1652_v11  ;;  %v3321_v0 = vsel %vm364_vm12, %v1592_v49, %v1596_v35  ;;  %v3325_v30 = vsel %vm364_vm12, %v1596_v35, %v1592_v49 }
 0x321   : > { %v1663_v48 = vmul.f32 %v3630_v62, %v1660_v21  ;;  %v1664_v15 = vmul.f32 %v3631_v17, %v1658_v6 }
 0x323   : > { %v1668_v53 = vpop.permute.xlu0 %1667  ;;  %v1666_v36 = vpop.permute.xlu1 %1665 }
 0x327   : > { %v1672_v54 = vpop.permute.xlu0 %1671  ;;  %v1670_v3 = vpop.permute.xlu1 %1669 }
 0x328   : > { %v1674_v46 = vsel %vm364_vm12, %v1668_v53, %v1672_v54  ;;  %v1676_v8 = vsel %vm364_vm12, %v1672_v54, %v1668_v53  ;;  %v1673_v9 = vsel %vm364_vm12, %v1666_v36, %v1670_v3  ;;  %v1675_v43 = vsel %vm364_vm12, %v1670_v3, %v1666_v36  ;;  %v3636_v36 = vld [vmem:[#allocation8_spill] sm:$0xff]  ;;  %v3637_v54 = vld [vmem:[#allocation9_spill] sm:$0xff] }
 0x329   : > { %v1679_v60 = vmul.f32 %v3632_v23, %v1676_v8  ;;  %v1680_v27 = vmul.f32 %v3633_v44, %v1674_v46  ;;  %v1677_v41 = vmul.f32 %v3632_v23, %v1675_v43  ;;  %v1678_v25 = vmul.f32 %v3633_v44, %v1673_v9 }
 0x32b   : > { %v1683_v7 = vadd.f32 %v1679_v60, %v1663_v48  ;;  %v1684_v22 = vadd.f32 %v1680_v27, %v1664_v15  ;;  %v3343_v59 = vpop.permute.xlu0 %1609  ;;  %v1681_v42 = vadd.f32 %v1677_v41, %v1661_v51  ;;  %v1682_v40 = vadd.f32 %v1678_v25, %v1662_v47  ;;  %v3345_v37 = vpop.permute.xlu1 %1611 }
 0x32d   : > { %v1685_v2 = vadd.f32 %v1681_v42, %v3220_v26  ;;  %v1686_v34 = vadd.f32 %v1682_v40, %v3224_v52  ;;  %v1687_v51 = vadd.f32 %v1683_v7, %v3226_v50  ;;  %v1688_v47 = vadd.f32 %v1684_v22, %v3232_v33 }
 0x32f   : > { %v1694_v20 = vpop.permute.xlu0 %1693  ;;  %v1690_v1 = vpop.permute.xlu1 %1689 }
 0x330   : > { %v1697_v57 = vsel %vm373_vm4, %v1690_v1, %v1694_v20  ;;  %v1699_v45 = vsel %vm373_vm4, %v1694_v20, %v1690_v1 }
 0x331   : > { %v1701_v38 = vmul.f32 %v3634_v55, %v1697_v57  ;;  %v1702_v31 = vmul.f32 %v3635_v5, %v1699_v45 }
 0x333   : > { %v1705_v10 = vadd.f32 %v1701_v38, %v1685_v2  ;;  %v1706_v11 = vadd.f32 %v1702_v31, %v1686_v34  ;;  %v1692_v49 = vpop.permute.xlu1 %1691  ;;  %v1710_v4 = vpop.permute.xlu0 %1709 }
 0x337   : > { %v1696_v35 = vpop.permute.xlu1 %1695  ;;  %v1714_v6 = vpop.permute.xlu0 %1713 }
 0x338   : > { %v1717_v21 = vsel %vm382_vm8, %v1710_v4, %v1714_v6  ;;  %v1719_v53 = vsel %vm382_vm8, %v1714_v6, %v1710_v4  ;;  %v1698_v48 = vsel %vm373_vm4, %v1692_v49, %v1696_v35  ;;  %v1700_v15 = vsel %vm373_vm4, %v1696_v35, %v1692_v49 }
 0x339   : > { %v1721_v26 = vmul.f32 %v3636_v36, %v1717_v21  ;;  %v1722_v52 = vmul.f32 %v3637_v54, %v1719_v53  ;;  %v1703_v9 = vmul.f32 %v3634_v55, %v1698_v48  ;;  %v1704_v43 = vmul.f32 %v3635_v5, %v1700_v15 }
 0x33b   : > { %v1725_v3 = vadd.f32 %v1721_v26, %v1705_v10  ;;  %v1726_v46 = vadd.f32 %v1722_v52, %v1706_v11  ;;  %v1712_v8 = vpop.permute.xlu1 %1711  ;;  %v1707_v20 = vadd.f32 %v1703_v9, %v1687_v51  ;;  %v1708_v1 = vadd.f32 %v1704_v43, %v1688_v47 }
 0x33d   : > { %v1739_v60 = vadd.f32 %v3295_v12, %v1725_v3  ;;  %v1740_v27 = vadd.f32 %v3295_v12, %v1726_v46 }
 0x33f   : > { %v1716_v41 = vpop.permute.xlu1 %1715  ;;  %v1752_v25 = vpop.permute.xlu0 %1751  ;;  %v1743_v22 = vmax.f32 %v1739_v60, 0.0  ;;  %v1744_v10 = vmax.f32 %v1740_v27, 0.0 }
 0x340   : > { %v1718_v42 = vsel %vm382_vm8, %v1712_v8, %v1716_v41  ;;  %v1720_v40 = vsel %vm382_vm8, %v1716_v41, %v1712_v8 }
 0x341   : > { %v1723_v57 = vmul.f32 %v3636_v36, %v1718_v42  ;;  %v1724_v45 = vmul.f32 %v3637_v54, %v1720_v40 }
 0x343   : > { %v1727_v2 = vadd.f32 %v1723_v57, %v1707_v20  ;;  %v1728_v12 = vadd.f32 %v1724_v45, %v1708_v1  ;;  %v1750_v34 = vpop.permute.xlu1 %1749  ;;  %v1756_v50 = vpop.permute.xlu0 %1755  ;;  %v3638_v45 = vld [vmem:[#allocation12_spill] sm:$0xff] }
 0x344   : > { %v1760_v20 = vsel %vm346_vm15, %v1756_v50, %v1752_v25 }
 0x345   : > { %v1741_v33 = vadd.f32 %v3297_v24, %v1727_v2  ;;  %v1742_v7 = vadd.f32 %v3297_v24, %v1728_v12 }
 0x347   : > { %v1745_v38 = vmax.f32 %v1741_v33, 0.0  ;;  %v1754_v31 = vpop.permute.xlu1 %1753  ;;  %v1746_v11 = vmax.f32 %v1742_v7, 0.0  ;;  %v1768_v49 = vpop.permute.xlu0 %1767  ;;  %v1758_v7 = vsel %vm346_vm15, %v1752_v25, %v1756_v50 }
 0x348   : > { %v1759_v43 = vsel %vm346_vm15, %v1754_v31, %v1750_v34  ;;  %v1757_v51 = vsel %vm346_vm15, %v1750_v34, %v1754_v31 }
 0x349   : > { %v3379_v4 = vpack.c.bf16 %v1746_v11, %v1744_v10  ;;  %v3381_v35 = vpack.c.bf16 %v1745_v38, %v1743_v22  ;;  %v1761_v2 = vmul.f32 %v3638_v45, %v1759_v43  ;;  %v3639_v22 = vld [vmem:[#allocation13_spill] sm:$0xff]  ;;  %v1763_v10 = vmul.f32 %v3638_v45, %v1760_v20 }
 0x34a   : > { %v1762_v38 = vmul.f32 %v3639_v22, %v1757_v51 }
 0x34b   : > { %v1766_v6 = vpop.permute.xlu1 %1765  ;;  %v1772_v21 = vpop.permute.xlu0 %1771 }
 0x34c   : > { %v1776_v60 = vsel %vm355_vm3, %v1772_v21, %v1768_v49  ;;  %v1774_v12 = vsel %vm355_vm3, %v1768_v49, %v1772_v21 }
 0x34d   : > { %v1779_v34 = vmul.f32 %v3630_v62, %v1776_v60 }
 0x34f   : > { %v1770_v53 = vpop.permute.xlu1 %1769  ;;  %v1788_v52 = vpop.permute.xlu0 %1787  ;;  %v1783_v50 = vadd.f32 %v1779_v34, %v1763_v10 }
 0x350   : > { %v1775_v8 = vsel %vm355_vm3, %v1770_v53, %v1766_v6  ;;  %v1773_v9 = vsel %vm355_vm3, %v1766_v6, %v1770_v53 }
 0x351   : > { %v1777_v47 = vmul.f32 %v3630_v62, %v1775_v8  ;;  %v1778_v1 = vmul.f32 %v3631_v17, %v1773_v9  ;;  %v1780_v62 = vmul.f32 %v3631_v17, %v1774_v12  ;;  %v1764_v9 = vmul.f32 %v3639_v22, %v1758_v7 }
 0x353   : > { %v1786_v26 = vpop.permute.xlu1 %1785  ;;  %v1792_v15 = vpop.permute.xlu0 %1791  ;;  %v1781_v11 = vadd.f32 %v1777_v47, %v1761_v2 }
 0x354   : > { %v1796_v57 = vsel %vm364_vm12, %v1792_v15, %v1788_v52  ;;  %v1794_v6 = vsel %vm364_vm12, %v1788_v52, %v1792_v15 }
 0x355   : > { %v1799_v53 = vmul.f32 %v3632_v23, %v1796_v57  ;;  %v1800_v43 = vmul.f32 %v3633_v44, %v1794_v6 }
 0x357   : > { %v1790_v48 = vpop.permute.xlu1 %1789  ;;  %v1803_v60 = vadd.f32 %v1799_v53, %v1783_v50  ;;  %v3641_v53 = vld [vmem:[#allocation4_spill] sm:$0xff] }
 0x358   : > { %v1795_v27 = vsel %vm364_vm12, %v1790_v48, %v1786_v26  ;;  %v1793_v41 = vsel %vm364_vm12, %v1786_v26, %v1790_v48  ;;  %v1782_v26 = vadd.f32 %v1778_v1, %v1762_v38 }
 0x359   : > { %v1797_v33 = vmul.f32 %v3632_v23, %v1795_v27  ;;  %v1798_v31 = vmul.f32 %v3633_v44, %v1793_v41  ;;  %v1784_v41 = vadd.f32 %v1780_v62, %v1764_v9 }
 0x35b   : > { %v1810_v3 = vpop.permute.xlu1 %1809  ;;  %v1801_v48 = vadd.f32 %v1797_v33, %v1781_v11  ;;  %v1802_v52 = vadd.f32 %v1798_v31, %v1782_v26  ;;  %v1804_v45 = vadd.f32 %v1800_v43, %v1784_v41  ;;  %v1807_v33 = vadd.f32 %v1803_v60, %v3259_v18  ;;  %v3640_v18 = vld [vmem:[#allocation5_spill] sm:$0xff] }
 0x35d   : > { %v1806_v2 = vadd.f32 %v1802_v52, %v3257_v58 }
 0x35f   : > { %v1814_v46 = vpop.permute.xlu1 %1813  ;;  %v1812_v24 = vpop.permute.xlu0 %1811 }
 0x360   : > { %v1817_v25 = vsel %vm373_vm4, %v1810_v3, %v1814_v46  ;;  %v1819_v8 = vsel %vm373_vm4, %v1814_v46, %v1810_v3  ;;  %v1805_v46 = vadd.f32 %v1801_v48, %v3253_v19 }
 0x361   : > { %v1821_v17 = vmul.f32 %v3634_v55, %v1817_v25  ;;  %v1822_v20 = vmul.f32 %v3635_v5, %v1819_v8 }
 0x363   : > { %v1830_v42 = vpop.permute.xlu1 %1829  ;;  %v1816_v40 = vpop.permute.xlu0 %1815  ;;  %v1825_v34 = vadd.f32 %v1821_v17, %v1805_v46 }
 0x364   : > { %v1818_v3 = vsel %vm373_vm4, %v1812_v24, %v1816_v40  ;;  %v1820_v1 = vsel %vm373_vm4, %v1816_v40, %v1812_v24  ;;  %v1826_v40 = vadd.f32 %v1822_v20, %v1806_v2 }
 0x365   : > { %v1823_v7 = vmul.f32 %v3634_v55, %v1818_v3  ;;  %v1824_v38 = vmul.f32 %v3635_v5, %v1820_v1  ;;  %v1601_v3 = vmul.f32 %v3632_v23, %v3309_v14 }
 0x367   : > { %v1834_v49 = vpop.permute.xlu1 %1833  ;;  %v1832_v21 = vpop.permute.xlu0 %1831  ;;  %v1827_v25 = vadd.f32 %v1823_v7, %v1807_v33 }
 0x368   : > { %v1837_v15 = vsel %vm382_vm8, %v1830_v42, %v1834_v49  ;;  %v1839_v27 = vsel %vm382_vm8, %v1834_v49, %v1830_v42 }
 0x369   : > { %v1841_v57 = vmul.f32 %v3636_v36, %v1837_v15  ;;  %v1842_v42 = vmul.f32 %v3637_v54, %v1839_v27 }
 0x36b   : > { %v1850_v51 = vpop.permute.xlu1 %1849  ;;  %v1836_v47 = vpop.permute.xlu0 %1835  ;;  %v1845_v10 = vadd.f32 %v1841_v57, %v1825_v34  ;;  %v1846_v62 = vadd.f32 %v1842_v42, %v1826_v40 }
 0x36c   : > { %v1838_v12 = vsel %vm382_vm8, %v1832_v21, %v1836_v47  ;;  %v1840_v19 = vsel %vm382_vm8, %v1836_v47, %v1832_v21  ;;  %v1808_v21 = vadd.f32 %v1804_v45, %v3262_v56  ;;  %v1603_v45 = vmul.f32 %v3632_v23, %v3325_v30 }
 0x36d   : > { %v1843_v11 = vmul.f32 %v3636_v36, %v1838_v12  ;;  %v1844_v26 = vmul.f32 %v3637_v54, %v1840_v19 }
 0x36e   : > { %v1828_v8 = vadd.f32 %v1824_v38, %v1808_v21  ;;  %v1607_v7 = vadd.f32 %v1603_v45, %v3214_v28 }
 0x36f   : > { %v1854_v22 = vpop.permute.xlu1 %1853  ;;  %v1852_v24 = vpop.permute.xlu0 %1851  ;;  %v1847_v52 = vadd.f32 %v1843_v11, %v1827_v25 }
 0x370   : > { %v1857_v58 = vsel %vm391_vm2, %v1850_v51, %v1854_v22  ;;  %v1859_v31 = vsel %vm391_vm2, %v1854_v22, %v1850_v51  ;;  %v1848_v60 = vadd.f32 %v1844_v26, %v1828_v8 }
 0x371   : > { %v1861_v6 = vmul.f32 %v3640_v18, %v1857_v58  ;;  %v1862_v49 = vmul.f32 %v3641_v53, %v1859_v31 }
 0x373   : > { %v1865_v50 = vadd.f32 %v1861_v6, %v1845_v10  ;;  %v1856_v48 = vpop.permute.xlu0 %1855  ;;  %v1866_v9 = vadd.f32 %v1862_v49, %v1846_v62  ;;  %v1616_v54 = vpop.permute.xlu1 %1615 }
 0x374   : > { %v1858_v43 = vsel %vm391_vm2, %v1852_v24, %v1856_v48  ;;  %v1860_v36 = vsel %vm391_vm2, %v1856_v48, %v1852_v24  ;;  %v1618_v46 = vsel %vm373_vm4, %v3345_v37, %v1616_v54  ;;  %v1620_v1 = vsel %vm373_vm4, %v1616_v54, %v3345_v37 }
 0x375   : > { %v1863_v15 = vmul.f32 %v3640_v18, %v1858_v43  ;;  %v1864_v56 = vmul.f32 %v3641_v53, %v1860_v36  ;;  %v1879_v17 = vadd.f32 %v3290_v63, %v1865_v50  ;;  %v1880_v47 = vadd.f32 %v3290_v63, %v1866_v9 }
 0x376   : > { %v1604_v63 = vmul.f32 %v3633_v44, %v3321_v0  ;;  %v1623_v30 = vmul.f32 %v3634_v55, %v1618_v46  ;;  %v1624_v23 = vmul.f32 %v3635_v5, %v1620_v1  ;;  %v1605_v24 = vadd.f32 %v1601_v3, %v3208_v39 }
 0x377   : > { %v1867_v27 = vadd.f32 %v1863_v15, %v1847_v52  ;;  %v1868_v51 = vadd.f32 %v1864_v56, %v1848_v60  ;;  %v1614_v20 = vpop.permute.xlu0 %1613  ;;  %v1883_v2 = vmax.f32 %v1879_v17, 0.0  ;;  %v1884_v34 = vmax.f32 %v1880_v47, 0.0 }
 0x378   : > { %v1617_v14 = vsel %vm373_vm4, %v3343_v59, %v1614_v20  ;;  %v1619_v12 = vsel %vm373_vm4, %v1614_v20, %v3343_v59  ;;  %v1608_v19 = vadd.f32 %v1604_v63, %v3218_v29  ;;  %vm1908_vm2 = vcmask 392192  }
 0x379   : > { %v1881_v41 = vadd.f32 %v3288_v32, %v1867_v27  ;;  %v1882_v57 = vadd.f32 %v3288_v32, %v1868_v51  ;;  %v1602_v32 = vmul.f32 %v3633_v44, %v3305_v13  ;;  %v1621_v22 = vmul.f32 %v3634_v55, %v1617_v14 }
 0x37a   : > { %v1622_v16 = vmul.f32 %v3635_v5, %v1619_v12  ;;  %v1627_v44 = vadd.f32 %v1623_v30, %v1607_v7  ;;  %v1628_v40 = vadd.f32 %v1624_v23, %v1608_v19 }
 0x37b   : > { %v1885_v42 = vmax.f32 %v1881_v41, 0.0  ;;  %v1886_v37 = vmax.f32 %v1882_v57, 0.0  ;;  %v1606_v13 = vadd.f32 %v1602_v32, %v3212_v61  ;;  %v1625_v28 = vadd.f32 %v1621_v22, %v1605_v24 }
 0x37d   : > { %v1887_v0 = vpack.c.bf16 %v1885_v42, %v1883_v2  ;;  %v1888_v33 = vpack.c.bf16 %v1886_v37, %v1884_v34  ;;  %v1626_v31 = vadd.f32 %v1622_v16, %v1606_v13 }
 0x37f   : > { %1922 = vmatprep.subr.bf16.mxu0 %v1888_v33 }
 0x380   : > { %v1637_v59 = vpop.permute.xlu1 %1636  ;;  %1923 = vmatpush1.bf16.msra.mxu0 %v1887_v0 }
 0x381   : > { %1924 = vmatprep.subr.bf16.mxu0 %v3379_v4  ;;  %v1641_v38 = vadd.f32 %v1637_v59, %v1627_v44  ;;  %v1642_v58 = vadd.f32 %v1637_v59, %v1628_v40  ;;  %v2327_v4 = vld [vmem:[%s3516_s3] sm:$0xff]  }
 0x383   : > { %v1645_v10 = vmax.f32 %v1641_v38, 0.0  ;;  %v1646_v11 = vmax.f32 %v1642_v58, 0.0 }
 0x384   : > { %v1632_v29 = vpop.permute.xlu0 %1631  ;;  %1925 = vmatpush1.bf16.msra.mxu0 %v3381_v35  ;;  %v1901_v53 = vpop.permute.xlu1 %1900 }
 0x385   : > { %v1639_v55 = vadd.f32 %v1632_v29, %v1625_v28  ;;  %v1640_v5 = vadd.f32 %v1632_v29, %v1626_v31 }
 0x387   : > { %v1643_v39 = vmax.f32 %v1639_v55, 0.0  ;;  %v1644_v18 = vmax.f32 %v1640_v5, 0.0 }
 0x388   : > { %v1896_v49 = vpop.permute.xlu0 %1895 }
 0x389   : > { %v1647_v61 = vpack.c.bf16 %v1645_v10, %v1643_v39  ;;  %v1648_v6 = vpack.c.bf16 %v1646_v11, %v1644_v18  ;;  %v1965_v35 = vpop.permute.xlu1 %1964 }
 0x38b   : > { %1926 = vmatprep.subr.bf16.mxu0 %v1648_v6 }
 0x38c   : > { %1927 = vmatpush1.bf16.msra.mxu0 %v1647_v61 }
 0x38d   : > { %v1961_v25 = vpop.permute.xlu0 %1960 }
 0x38e   : > { %v1973_v9 = vpop.permute.xlu1 %1972 }
 0x38f   : > { %2161 = vmatmul.mubr.msk.bf16.vlgmr.msra.gmra.mxu0 %vm1908_vm2, %v2327_v4 }
 0x392   : > { %v1977_v27 = vpop.permute.xlu0 %1976 }
 0x44f   : > { %v1946_v21 = vpop.f32.mrf.mxu0 }
 0x450   : > { %v1947_v62 = vadd.f32 %v1946_v21, %v1896_v49 }
 0x451   : > { %v1948_v26 = vpop.f32.mrf.mxu0 }
 0x452   : > { %v1955_v50 = vmax.f32 %v1947_v62, 0.0  ;;  %v1949_v48 = vadd.f32 %v1948_v26, %v1896_v49 }
 0x453   : > { %v1950_v8 = vpop.f32.mrf.mxu0 }
 0x454   : > { %v1956_v43 = vmax.f32 %v1949_v48, 0.0  ;;  %v1951_v36 = vadd.f32 %v1950_v8, %v1901_v53  ;;  %v1967_v52 = vmul.f32 %v1961_v25, %v1955_v50 }
 0x455   : > { %v1952_v15 = vpop.f32.mrf.mxu0 }
 0x456   : > { %v1957_v60 = vmax.f32 %v1951_v36, 0.0  ;;  %v1968_v56 = vmul.f32 %v1961_v25, %v1956_v43  ;;  %v1979_v17 = vadd.f32 %v1973_v9, %v1967_v52  ;;  %v1953_v54 = vadd.f32 %v1952_v15, %v1901_v53 }
 0x458   : > { %v1980_v51 = vadd.f32 %v1973_v9, %v1968_v56  ;;  %1983 = vst [vmem:[%s268_s26] sm:$0xff] %v1979_v17  ;;  %v1958_v47 = vmax.f32 %v1953_v54, 0.0  ;;  %v1969_v41 = vmul.f32 %v1965_v35, %v1957_v60 }
 0x45a   : > { %1984 = vst [vmem:[%s268_s26 + $0x8] sm:$0xff] %v1980_v51  ;;  %v1970_v20 = vmul.f32 %v1965_v35, %v1958_v47  ;;  %v1981_v3 = vadd.f32 %v1977_v27, %v1969_v41  ;;  %1993 = sbr.rel (!%p2427_p4) target bundleno = 1127 (0x467), region = 52 }
 0x45c   : > { %v1982_v46 = vadd.f32 %v1977_v27, %v1970_v20  ;;  %1985 = vst [vmem:[%s268_s26 + $0x10] sm:$0xff] %v1981_v3 }
 0x45e   : > { %1986 = vst [vmem:[%s268_s26 + $0x18] sm:$0xff] %v1982_v46 }
 0x45f   : > { %v2009_v1 = vld [vmem:[%s268_s26] sm:$0xff] }
 0x460   : > { %2010 = vst [vmem:[%s1996_s10] sm:$0xff] %v2009_v1 }
 0x461   : > { %v2011_v57 = vld [vmem:[%s268_s26 + $0x8] sm:$0xff] }
 0x462   : > { %2012 = vst [vmem:[%s1996_s10 + $0x8] sm:$0xff] %v2011_v57 }
 0x463   : > { %v2013_v45 = vld [vmem:[%s268_s26 + $0x10] sm:$0xff] }
 0x464   : > { %2014 = vst [vmem:[%s1996_s10 + $0x20] sm:$0xff] %v2013_v45 }
 0x465   : > { %v2015_v63 = vld [vmem:[%s268_s26 + $0x18] sm:$0xff] }
 0x466   : > { %2016 = vst [vmem:[%s1996_s10 + $0x28] sm:$0xff] %v2015_v63 }
 0x467 PF: > { %p14_p8 = scmp.ge.s32.totalorder %s2417_s28, 4   ;;  %s3642_s24 = smov %s2346_s25 }
 0x468   : > { %s3643_s25 = smov %s2425_s8  ;;  %s3644_s26 = smov %s2417_s28 }
 0x469   :  { %16 = sbr.rel (!%p14_p8) target bundleno = 2 (0x2), region = 101 }

</bundles_post_ra>
